<compile_context>
chip_gen: v7x
topology: tpu7x:2x2x1
jax: 0.10.0
libtpu: 0.0.40
codegen_flags: <defaults>
</compile_context>

<pallas_src>
import functools

import jax
import jax.numpy as jnp
from jax.experimental import pallas as pl
from jax.experimental.pallas import tpu as pltpu


# ----------------------------------------------------------------------------
# Fused forward-pass kernel
# ----------------------------------------------------------------------------
def _gatconv_body(h_in, W, attW, bias_row, adj_mask, heads, dim, neg_slope=0.2):
    """One dense GATConv layer, fully in-VMEM.

    h_in:     [N, Fin]     node features (lane-dense)
    W:        [Fin, H*D]   feature projection (no bias, GATConv default)
    attW:     [H*D, 2*H]   block-diagonal attention weights; columns
                           (2h, 2h+1) hold (a_src, a_dst) of head h
    bias_row: [1, H*D]     GATConv bias (added to concatenated heads)
    adj_mask: [N, N] bool  adj_mask[i, j] <=> edge j -> i (self-loops incl.)
    returns:  [N, H*D]     concatenated per-head outputs + bias
    """
    # Projection + all-head attention scores on the MXU.
    h = jnp.dot(h_in, W, preferred_element_type=jnp.float32)      # [N, H*D]
    s = jnp.dot(h, attW, preferred_element_type=jnp.float32)      # [N, 2*H]

    outs = []
    for hd in range(heads):
        s_src = s[:, 2 * hd:2 * hd + 1]                           # [N, 1]
        s_dst = s[:, 2 * hd + 1:2 * hd + 2]                       # [N, 1]
        # e[i, j] = LeakyReLU(s_dst[i] + s_src[j]), slope 0.2
        e = s_dst + jnp.transpose(s_src)                          # [N, N]
        e = jnp.where(e > 0, e, neg_slope * e)
        e = jnp.where(adj_mask, e, jnp.float32(-1e30))
        # numerically stable softmax over incoming neighbors (row-wise),
        # with the normalization folded into a post-aggregation scale.
        e = e - jnp.max(e, axis=-1, keepdims=True)
        p = jnp.exp(e)                                            # [N, N]
        row_sum = jnp.sum(p, axis=-1, keepdims=True)              # [N, 1]
        agg = jnp.dot(p, h[:, hd * dim:(hd + 1) * dim],
                      preferred_element_type=jnp.float32)         # [N, D]
        outs.append(agg * pl.reciprocal(row_sum, approx=True))
    out = jnp.concatenate(outs, axis=-1) + bias_row               # [N, H*D]
    return out


def _gat_forward_kernel(*refs, conv_cfgs, fc_two_layer):
    # refs = [x, adj, (W, attW, bias) per conv layer..., fc params..., out]
    out_ref = refs[-1]
    x_ref, adj_ref = refs[0], refs[1]
    idx = 2

    adj_mask = adj_ref[...] > 0.0           # loaded once, reused by all layers
    h = x_ref[...]

    for (heads, dim) in conv_cfgs:
        W = refs[idx][...]
        attW = refs[idx + 1][...]
        bias = refs[idx + 2][...]
        idx += 3
        h = _gatconv_body(h, W, attW, bias, adj_mask, heads, dim)
        h = jnp.maximum(h, 0.0)             # F.relu(GATConv(...))
        # F.dropout(p=0.5) in eval mode -> identity

    if fc_two_layer:
        W1, b1 = refs[idx][...], refs[idx + 1][...]
        W2, b2 = refs[idx + 2][...], refs[idx + 3][...]
        h = jnp.maximum(jnp.dot(h, W1, preferred_element_type=jnp.float32) + b1, 0.0)
        h = jnp.dot(h, W2, preferred_element_type=jnp.float32) + b2
    else:
        W1, b1 = refs[idx][...], refs[idx + 1][...]
        h = jnp.dot(h, W1, preferred_element_type=jnp.float32) + b1

    out_ref[...] = h.astype(out_ref.dtype)


def gat_forward(x, adj, params):
    """Single fused pallas_call for the whole GAT forward pass."""
    conv_params = params["convs"]     # list of (W, attW, bias_row, heads, dim)
    fc_params = params["fc"]          # (W1, b1) or (W1, b1, W2, b2)

    inputs = [x, adj]
    conv_cfgs = []
    for (W, attW, bias, heads, dim) in conv_params:
        inputs += [W, attW, bias]
        conv_cfgs.append((heads, dim))
    inputs += list(fc_params)

    fc_two_layer = len(fc_params) == 4
    n = x.shape[0]
    embed_dim = fc_params[-1].shape[-1]

    vmem = pl.BlockSpec(memory_space=pltpu.MemorySpace.VMEM)
    kernel = functools.partial(_gat_forward_kernel,
                               conv_cfgs=tuple(conv_cfgs),
                               fc_two_layer=fc_two_layer)
    return pl.pallas_call(
        kernel,
        out_shape=jax.ShapeDtypeStruct((n, embed_dim), jnp.float32),
        in_specs=[vmem] * len(inputs),
        out_specs=vmem,
    )(*inputs)


# ----------------------------------------------------------------------------
# Parameter construction (deterministic xavier/glorot-style init)
# ----------------------------------------------------------------------------
def xavier_uniform(key, shape, fan_in, fan_out):
    bound = (6.0 / (fan_in + fan_out)) ** 0.5
    return jax.random.uniform(key, shape, jnp.float32, -bound, bound)


def make_gatconv_params(key, in_dim, out_dim, heads):
    k1, k2, k3 = jax.random.split(key, 3)
    W = xavier_uniform(k1, (in_dim, heads * out_dim), in_dim, heads * out_dim)
    a_src = xavier_uniform(k2, (heads, out_dim), out_dim, 1)
    a_dst = xavier_uniform(k3, (heads, out_dim), out_dim, 1)
    # Block-diagonal attention weight so a single [N, H*D] @ [H*D, 2H] matmul
    # yields (s_src, s_dst) for every head on the MXU.
    attW = jnp.zeros((heads * out_dim, 2 * heads), jnp.float32)
    for h in range(heads):
        attW = attW.at[h * out_dim:(h + 1) * out_dim, 2 * h].set(a_src[h])
        attW = attW.at[h * out_dim:(h + 1) * out_dim, 2 * h + 1].set(a_dst[h])
    bias = jnp.zeros((1, heads * out_dim), jnp.float32)   # GATConv bias (zeros init)
    return (W, attW, bias, heads, out_dim)


def make_params(key, feat_dim, num_layers, hidden_dim, embed_dim, in_heads, out_heads):
    keys = jax.random.split(key, num_layers + 2)
    convs = [make_gatconv_params(keys[0], feat_dim, hidden_dim, in_heads)]
    for i in range(num_layers - 2):
        convs.append(make_gatconv_params(keys[1 + i], hidden_dim * in_heads,
                                         hidden_dim, in_heads))
    if num_layers > 1:
        convs.append(make_gatconv_params(keys[num_layers - 1], hidden_dim * in_heads,
                                         embed_dim // out_heads, out_heads))
        kf1, kf2 = jax.random.split(keys[num_layers], 2)
        W1 = xavier_uniform(kf1, (embed_dim, hidden_dim), embed_dim, hidden_dim)
        W2 = xavier_uniform(kf2, (hidden_dim, embed_dim), hidden_dim, embed_dim)
        fc = (W1, jnp.zeros((1, hidden_dim), jnp.float32),
              W2, jnp.zeros((1, embed_dim), jnp.float32))
    else:
        W1 = xavier_uniform(keys[num_layers], (hidden_dim * in_heads, embed_dim),
                            hidden_dim * in_heads, embed_dim)
        fc = (W1, jnp.zeros((1, embed_dim), jnp.float32))
    return {"convs": convs, "fc": fc}


# ----------------------------------------------------------------------------
def edge_index_to_adj(edge_index, num_nodes):
    src, dst = edge_index[0], edge_index[1]
    adj = jnp.zeros((num_nodes, num_nodes), jnp.float32)
    adj = adj.at[dst, src].set(1.0)                       # message j -> i at adj[i, j]
    adj = adj + jnp.eye(num_nodes, dtype=jnp.float32)     # add_self_loops=True
    return jnp.minimum(adj, 1.0)


# ----------------------------------------------------------------------------
if __name__ == "__main__":
    # Model hyperparameters (small, consistent with module __init__)
    FEAT_DIM, NUM_LAYERS, HIDDEN_DIM, EMBED_DIM = 16, 3, 32, 64
    IN_HEADS, OUT_HEADS = 4, 2
    N_NODES = 16

    key = jax.random.PRNGKey(0)
    k_x, k_p = jax.random.split(key)

    # deterministic inputs: node features + ring-graph connectivity
    x = jax.random.normal(k_x, (N_NODES, FEAT_DIM), jnp.float32)
    fwd = jnp.stack([jnp.arange(N_NODES), (jnp.arange(N_NODES) + 1) % N_NODES])
    edge_index = jnp.concatenate([fwd, fwd[::-1]], axis=1).astype(jnp.int32)  # [2, 2N]
    adj = edge_index_to_adj(edge_index, N_NODES)

    params = make_params(k_p, FEAT_DIM, NUM_LAYERS, HIDDEN_DIM, EMBED_DIM,
                         IN_HEADS, OUT_HEADS)

    out = gat_forward(x, adj, params)
    out = jax.block_until_ready(out)
    assert out.shape == (N_NODES, EMBED_DIM), out.shape
    assert bool(jnp.all(jnp.isfinite(out)))
    print("KERNEL_OK")
</pallas_src>

<mosaic_0001>
module attributes {stable_mosaic.version = 11 : i64} {
  func.func @_gat_forward_kernel(%arg0: memref<16x16xf32, #tpu.memory_space<vmem>>, %arg1: memref<16x16xf32, #tpu.memory_space<vmem>>, %arg2: memref<16x128xf32, #tpu.memory_space<vmem>>, %arg3: memref<128x8xf32, #tpu.memory_space<vmem>>, %arg4: memref<1x128xf32, #tpu.memory_space<vmem>>, %arg5: memref<128x128xf32, #tpu.memory_space<vmem>>, %arg6: memref<128x8xf32, #tpu.memory_space<vmem>>, %arg7: memref<1x128xf32, #tpu.memory_space<vmem>>, %arg8: memref<128x64xf32, #tpu.memory_space<vmem>>, %arg9: memref<64x4xf32, #tpu.memory_space<vmem>>, %arg10: memref<1x64xf32, #tpu.memory_space<vmem>>, %arg11: memref<64x32xf32, #tpu.memory_space<vmem>>, %arg12: memref<1x32xf32, #tpu.memory_space<vmem>>, %arg13: memref<32x64xf32, #tpu.memory_space<vmem>>, %arg14: memref<1x64xf32, #tpu.memory_space<vmem>>, %arg15: memref<16x64xf32, #tpu.memory_space<vmem>>) attributes {dimension_semantics = [], scalar_prefetch = 0 : i64, scratch_operands = 0 : i64, tpu.core_type = #tpu.core_type<tc>} {
    %c0 = arith.constant 0 : index
    %c0_0 = arith.constant 0 : index
    %0 = vector.load %arg1[%c0, %c0_0] : memref<16x16xf32, #tpu.memory_space<vmem>>, vector<16x16xf32>
    %cst = arith.constant 0.000000e+00 : f32
    %1 = vector.broadcast %cst : f32 to vector<16x16xf32>
    %2 = arith.cmpf ogt, %0, %1 : vector<16x16xf32>
    %c0_1 = arith.constant 0 : index
    %c0_2 = arith.constant 0 : index
    %3 = vector.load %arg0[%c0_1, %c0_2] : memref<16x16xf32, #tpu.memory_space<vmem>>, vector<16x16xf32>
    %c0_3 = arith.constant 0 : index
    %c0_4 = arith.constant 0 : index
    %4 = vector.load %arg2[%c0_3, %c0_4] : memref<16x128xf32, #tpu.memory_space<vmem>>, vector<16x128xf32>
    %c0_5 = arith.constant 0 : index
    %c0_6 = arith.constant 0 : index
    %5 = vector.load %arg3[%c0_5, %c0_6] : memref<128x8xf32, #tpu.memory_space<vmem>>, vector<128x8xf32>
    %c0_7 = arith.constant 0 : index
    %c0_8 = arith.constant 0 : index
    %6 = vector.load %arg4[%c0_7, %c0_8] : memref<1x128xf32, #tpu.memory_space<vmem>>, vector<1x128xf32>
    %cst_9 = arith.constant dense<0.000000e+00> : vector<16x128xf32>
    %7 = tpu.matmul %3, %4, %cst_9 {dimension_numbers = #tpu.dot_dimension_numbers<[1], [0], [0], [1], [0, 0, 1, 1], [], []>} : vector<16x16xf32>, vector<16x128xf32>, vector<16x128xf32> -> vector<16x128xf32>
    %cst_10 = arith.constant dense<0.000000e+00> : vector<16x8xf32>
    %8 = tpu.matmul %7, %5, %cst_10 {dimension_numbers = #tpu.dot_dimension_numbers<[1], [0], [0], [1], [0, 0, 1, 1], [], []>} : vector<16x128xf32>, vector<128x8xf32>, vector<16x8xf32> -> vector<16x8xf32>
    %9 = vector.extract_strided_slice %8 {offsets = [0, 0], sizes = [16, 1], strides = [1, 1]} : vector<16x8xf32> to vector<16x1xf32>
    %10 = vector.extract_strided_slice %8 {offsets = [0, 1], sizes = [16, 1], strides = [1, 1]} : vector<16x8xf32> to vector<16x1xf32>
    %11 = tpu.transpose %9, [1, 0] : vector<16x1xf32> -> vector<1x16xf32>
    %12 = vector.broadcast %10 : vector<16x1xf32> to vector<16x16xf32>
    %13 = vector.broadcast %11 : vector<1x16xf32> to vector<16x16xf32>
    %14 = arith.addf %12, %13 : vector<16x16xf32>
    %cst_11 = arith.constant 0.000000e+00 : f32
    %15 = vector.broadcast %cst_11 : f32 to vector<16x16xf32>
    %16 = arith.cmpf ogt, %14, %15 : vector<16x16xf32>
    %cst_12 = arith.constant 2.000000e-01 : f32
    %17 = vector.broadcast %cst_12 : f32 to vector<16x16xf32>
    %18 = arith.mulf %17, %14 : vector<16x16xf32>
    %19 = arith.select %16, %14, %18 : vector<16x16xi1>, vector<16x16xf32>
    %cst_13 = arith.constant -1.000000e+30 : f32
    %20 = vector.broadcast %cst_13 : f32 to vector<16x16xf32>
    %21 = arith.select %2, %19, %20 : vector<16x16xi1>, vector<16x16xf32>
    %cst_14 = arith.constant dense<0xFF800000> : vector<16xf32>
    %22 = vector.multi_reduction <maximumf>, %21, %cst_14 [1] : vector<16x16xf32> to vector<16xf32>
    %23 = vector.shape_cast %22 : vector<16xf32> to vector<16x1xf32>
    %24 = vector.broadcast %23 : vector<16x1xf32> to vector<16x16xf32>
    %25 = arith.subf %21, %24 : vector<16x16xf32>
    %26 = math.exp %25 : vector<16x16xf32>
    %cst_15 = arith.constant dense<0.000000e+00> : vector<16xf32>
    %27 = vector.multi_reduction <add>, %26, %cst_15 [1] : vector<16x16xf32> to vector<16xf32>
    %28 = vector.shape_cast %27 : vector<16xf32> to vector<16x1xf32>
    %29 = vector.extract_strided_slice %7 {offsets = [0, 0], sizes = [16, 32], strides = [1, 1]} : vector<16x128xf32> to vector<16x32xf32>
    %cst_16 = arith.constant dense<0.000000e+00> : vector<16x32xf32>
    %30 = tpu.matmul %26, %29, %cst_16 {dimension_numbers = #tpu.dot_dimension_numbers<[1], [0], [0], [1], [0, 0, 1, 1], [], []>} : vector<16x16xf32>, vector<16x32xf32>, vector<16x32xf32> -> vector<16x32xf32>
    %31 = tpu.reciprocal %28 {approx = true} : vector<16x1xf32> -> vector<16x1xf32>
    %32 = vector.broadcast %31 : vector<16x1xf32> to vector<16x32xf32>
    %33 = arith.mulf %30, %32 : vector<16x32xf32>
    %34 = vector.extract_strided_slice %8 {offsets = [0, 2], sizes = [16, 1], strides = [1, 1]} : vector<16x8xf32> to vector<16x1xf32>
    %35 = vector.extract_strided_slice %8 {offsets = [0, 3], sizes = [16, 1], strides = [1, 1]} : vector<16x8xf32> to vector<16x1xf32>
    %36 = tpu.transpose %34, [1, 0] : vector<16x1xf32> -> vector<1x16xf32>
    %37 = vector.broadcast %35 : vector<16x1xf32> to vector<16x16xf32>
    %38 = vector.broadcast %36 : vector<1x16xf32> to vector<16x16xf32>
    %39 = arith.addf %37, %38 : vector<16x16xf32>
    %cst_17 = arith.constant 0.000000e+00 : f32
    %40 = vector.broadcast %cst_17 : f32 to vector<16x16xf32>
    %41 = arith.cmpf ogt, %39, %40 : vector<16x16xf32>
    %cst_18 = arith.constant 2.000000e-01 : f32
    %42 = vector.broadcast %cst_18 : f32 to vector<16x16xf32>
    %43 = arith.mulf %42, %39 : vector<16x16xf32>
    %44 = arith.select %41, %39, %43 : vector<16x16xi1>, vector<16x16xf32>
    %cst_19 = arith.constant -1.000000e+30 : f32
    %45 = vector.broadcast %cst_19 : f32 to vector<16x16xf32>
    %46 = arith.select %2, %44, %45 : vector<16x16xi1>, vector<16x16xf32>
    %cst_20 = arith.constant dense<0xFF800000> : vector<16xf32>
    %47 = vector.multi_reduction <maximumf>, %46, %cst_20 [1] : vector<16x16xf32> to vector<16xf32>
    %48 = vector.shape_cast %47 : vector<16xf32> to vector<16x1xf32>
    %49 = vector.broadcast %48 : vector<16x1xf32> to vector<16x16xf32>
    %50 = arith.subf %46, %49 : vector<16x16xf32>
    %51 = math.exp %50 : vector<16x16xf32>
    %cst_21 = arith.constant dense<0.000000e+00> : vector<16xf32>
    %52 = vector.multi_reduction <add>, %51, %cst_21 [1] : vector<16x16xf32> to vector<16xf32>
    %53 = vector.shape_cast %52 : vector<16xf32> to vector<16x1xf32>
    %54 = vector.extract_strided_slice %7 {offsets = [0, 32], sizes = [16, 32], strides = [1, 1]} : vector<16x128xf32> to vector<16x32xf32>
    %cst_22 = arith.constant dense<0.000000e+00> : vector<16x32xf32>
    %55 = tpu.matmul %51, %54, %cst_22 {dimension_numbers = #tpu.dot_dimension_numbers<[1], [0], [0], [1], [0, 0, 1, 1], [], []>} : vector<16x16xf32>, vector<16x32xf32>, vector<16x32xf32> -> vector<16x32xf32>
    %56 = tpu.reciprocal %53 {approx = true} : vector<16x1xf32> -> vector<16x1xf32>
    %57 = vector.broadcast %56 : vector<16x1xf32> to vector<16x32xf32>
    %58 = arith.mulf %55, %57 : vector<16x32xf32>
    %59 = vector.extract_strided_slice %8 {offsets = [0, 4], sizes = [16, 1], strides = [1, 1]} : vector<16x8xf32> to vector<16x1xf32>
    %60 = vector.extract_strided_slice %8 {offsets = [0, 5], sizes = [16, 1], strides = [1, 1]} : vector<16x8xf32> to vector<16x1xf32>
    %61 = tpu.transpose %59, [1, 0] : vector<16x1xf32> -> vector<1x16xf32>
    %62 = vector.broadcast %60 : vector<16x1xf32> to vector<16x16xf32>
    %63 = vector.broadcast %61 : vector<1x16xf32> to vector<16x16xf32>
    %64 = arith.addf %62, %63 : vector<16x16xf32>
    %cst_23 = arith.constant 0.000000e+00 : f32
    %65 = vector.broadcast %cst_23 : f32 to vector<16x16xf32>
    %66 = arith.cmpf ogt, %64, %65 : vector<16x16xf32>
    %cst_24 = arith.constant 2.000000e-01 : f32
    %67 = vector.broadcast %cst_24 : f32 to vector<16x16xf32>
    %68 = arith.mulf %67, %64 : vector<16x16xf32>
    %69 = arith.select %66, %64, %68 : vector<16x16xi1>, vector<16x16xf32>
    %cst_25 = arith.constant -1.000000e+30 : f32
    %70 = vector.broadcast %cst_25 : f32 to vector<16x16xf32>
    %71 = arith.select %2, %69, %70 : vector<16x16xi1>, vector<16x16xf32>
    %cst_26 = arith.constant dense<0xFF800000> : vector<16xf32>
    %72 = vector.multi_reduction <maximumf>, %71, %cst_26 [1] : vector<16x16xf32> to vector<16xf32>
    %73 = vector.shape_cast %72 : vector<16xf32> to vector<16x1xf32>
    %74 = vector.broadcast %73 : vector<16x1xf32> to vector<16x16xf32>
    %75 = arith.subf %71, %74 : vector<16x16xf32>
    %76 = math.exp %75 : vector<16x16xf32>
    %cst_27 = arith.constant dense<0.000000e+00> : vector<16xf32>
    %77 = vector.multi_reduction <add>, %76, %cst_27 [1] : vector<16x16xf32> to vector<16xf32>
    %78 = vector.shape_cast %77 : vector<16xf32> to vector<16x1xf32>
    %79 = vector.extract_strided_slice %7 {offsets = [0, 64], sizes = [16, 32], strides = [1, 1]} : vector<16x128xf32> to vector<16x32xf32>
    %cst_28 = arith.constant dense<0.000000e+00> : vector<16x32xf32>
    %80 = tpu.matmul %76, %79, %cst_28 {dimension_numbers = #tpu.dot_dimension_numbers<[1], [0], [0], [1], [0, 0, 1, 1], [], []>} : vector<16x16xf32>, vector<16x32xf32>, vector<16x32xf32> -> vector<16x32xf32>
    %81 = tpu.reciprocal %78 {approx = true} : vector<16x1xf32> -> vector<16x1xf32>
    %82 = vector.broadcast %81 : vector<16x1xf32> to vector<16x32xf32>
    %83 = arith.mulf %80, %82 : vector<16x32xf32>
    %84 = vector.extract_strided_slice %8 {offsets = [0, 6], sizes = [16, 1], strides = [1, 1]} : vector<16x8xf32> to vector<16x1xf32>
    %85 = vector.extract_strided_slice %8 {offsets = [0, 7], sizes = [16, 1], strides = [1, 1]} : vector<16x8xf32> to vector<16x1xf32>
    %86 = tpu.transpose %84, [1, 0] : vector<16x1xf32> -> vector<1x16xf32>
    %87 = vector.broadcast %85 : vector<16x1xf32> to vector<16x16xf32>
    %88 = vector.broadcast %86 : vector<1x16xf32> to vector<16x16xf32>
    %89 = arith.addf %87, %88 : vector<16x16xf32>
    %cst_29 = arith.constant 0.000000e+00 : f32
    %90 = vector.broadcast %cst_29 : f32 to vector<16x16xf32>
    %91 = arith.cmpf ogt, %89, %90 : vector<16x16xf32>
    %cst_30 = arith.constant 2.000000e-01 : f32
    %92 = vector.broadcast %cst_30 : f32 to vector<16x16xf32>
    %93 = arith.mulf %92, %89 : vector<16x16xf32>
    %94 = arith.select %91, %89, %93 : vector<16x16xi1>, vector<16x16xf32>
    %cst_31 = arith.constant -1.000000e+30 : f32
    %95 = vector.broadcast %cst_31 : f32 to vector<16x16xf32>
    %96 = arith.select %2, %94, %95 : vector<16x16xi1>, vector<16x16xf32>
    %cst_32 = arith.constant dense<0xFF800000> : vector<16xf32>
    %97 = vector.multi_reduction <maximumf>, %96, %cst_32 [1] : vector<16x16xf32> to vector<16xf32>
    %98 = vector.shape_cast %97 : vector<16xf32> to vector<16x1xf32>
    %99 = vector.broadcast %98 : vector<16x1xf32> to vector<16x16xf32>
    %100 = arith.subf %96, %99 : vector<16x16xf32>
    %101 = math.exp %100 : vector<16x16xf32>
    %cst_33 = arith.constant dense<0.000000e+00> : vector<16xf32>
    %102 = vector.multi_reduction <add>, %101, %cst_33 [1] : vector<16x16xf32> to vector<16xf32>
    %103 = vector.shape_cast %102 : vector<16xf32> to vector<16x1xf32>
    %104 = vector.extract_strided_slice %7 {offsets = [0, 96], sizes = [16, 32], strides = [1, 1]} : vector<16x128xf32> to vector<16x32xf32>
    %cst_34 = arith.constant dense<0.000000e+00> : vector<16x32xf32>
    %105 = tpu.matmul %101, %104, %cst_34 {dimension_numbers = #tpu.dot_dimension_numbers<[1], [0], [0], [1], [0, 0, 1, 1], [], []>} : vector<16x16xf32>, vector<16x32xf32>, vector<16x32xf32> -> vector<16x32xf32>
    %106 = tpu.reciprocal %103 {approx = true} : vector<16x1xf32> -> vector<16x1xf32>
    %107 = vector.broadcast %106 : vector<16x1xf32> to vector<16x32xf32>
    %108 = arith.mulf %105, %107 : vector<16x32xf32>
    %109 = tpu.concatenate %33, %58, %83, %108 in 1 : vector<16x32xf32>, vector<16x32xf32>, vector<16x32xf32>, vector<16x32xf32> -> vector<16x128xf32>
    %110 = vector.broadcast %6 : vector<1x128xf32> to vector<16x128xf32>
    %111 = arith.addf %109, %110 : vector<16x128xf32>
    %cst_35 = arith.constant 0.000000e+00 : f32
    %112 = vector.broadcast %cst_35 : f32 to vector<16x128xf32>
    %113 = arith.maximumf %111, %112 : vector<16x128xf32>
    %c0_36 = arith.constant 0 : index
    %c0_37 = arith.constant 0 : index
    %114 = vector.load %arg5[%c0_36, %c0_37] : memref<128x128xf32, #tpu.memory_space<vmem>>, vector<128x128xf32>
    %c0_38 = arith.constant 0 : index
    %c0_39 = arith.constant 0 : index
    %115 = vector.load %arg6[%c0_38, %c0_39] : memref<128x8xf32, #tpu.memory_space<vmem>>, vector<128x8xf32>
    %c0_40 = arith.constant 0 : index
    %c0_41 = arith.constant 0 : index
    %116 = vector.load %arg7[%c0_40, %c0_41] : memref<1x128xf32, #tpu.memory_space<vmem>>, vector<1x128xf32>
    %cst_42 = arith.constant dense<0.000000e+00> : vector<16x128xf32>
    %117 = tpu.matmul %113, %114, %cst_42 {dimension_numbers = #tpu.dot_dimension_numbers<[1], [0], [0], [1], [0, 0, 1, 1], [], []>} : vector<16x128xf32>, vector<128x128xf32>, vector<16x128xf32> -> vector<16x128xf32>
    %cst_43 = arith.constant dense<0.000000e+00> : vector<16x8xf32>
    %118 = tpu.matmul %117, %115, %cst_43 {dimension_numbers = #tpu.dot_dimension_numbers<[1], [0], [0], [1], [0, 0, 1, 1], [], []>} : vector<16x128xf32>, vector<128x8xf32>, vector<16x8xf32> -> vector<16x8xf32>
    %119 = vector.extract_strided_slice %118 {offsets = [0, 0], sizes = [16, 1], strides = [1, 1]} : vector<16x8xf32> to vector<16x1xf32>
    %120 = vector.extract_strided_slice %118 {offsets = [0, 1], sizes = [16, 1], strides = [1, 1]} : vector<16x8xf32> to vector<16x1xf32>
    %121 = tpu.transpose %119, [1, 0] : vector<16x1xf32> -> vector<1x16xf32>
    %122 = vector.broadcast %120 : vector<16x1xf32> to vector<16x16xf32>
    %123 = vector.broadcast %121 : vector<1x16xf32> to vector<16x16xf32>
    %124 = arith.addf %122, %123 : vector<16x16xf32>
    %cst_44 = arith.constant 0.000000e+00 : f32
    %125 = vector.broadcast %cst_44 : f32 to vector<16x16xf32>
    %126 = arith.cmpf ogt, %124, %125 : vector<16x16xf32>
    %cst_45 = arith.constant 2.000000e-01 : f32
    %127 = vector.broadcast %cst_45 : f32 to vector<16x16xf32>
    %128 = arith.mulf %127, %124 : vector<16x16xf32>
    %129 = arith.select %126, %124, %128 : vector<16x16xi1>, vector<16x16xf32>
    %cst_46 = arith.constant -1.000000e+30 : f32
    %130 = vector.broadcast %cst_46 : f32 to vector<16x16xf32>
    %131 = arith.select %2, %129, %130 : vector<16x16xi1>, vector<16x16xf32>
    %cst_47 = arith.constant dense<0xFF800000> : vector<16xf32>
    %132 = vector.multi_reduction <maximumf>, %131, %cst_47 [1] : vector<16x16xf32> to vector<16xf32>
    %133 = vector.shape_cast %132 : vector<16xf32> to vector<16x1xf32>
    %134 = vector.broadcast %133 : vector<16x1xf32> to vector<16x16xf32>
    %135 = arith.subf %131, %134 : vector<16x16xf32>
    %136 = math.exp %135 : vector<16x16xf32>
    %cst_48 = arith.constant dense<0.000000e+00> : vector<16xf32>
    %137 = vector.multi_reduction <add>, %136, %cst_48 [1] : vector<16x16xf32> to vector<16xf32>
    %138 = vector.shape_cast %137 : vector<16xf32> to vector<16x1xf32>
    %139 = vector.extract_strided_slice %117 {offsets = [0, 0], sizes = [16, 32], strides = [1, 1]} : vector<16x128xf32> to vector<16x32xf32>
    %cst_49 = arith.constant dense<0.000000e+00> : vector<16x32xf32>
    %140 = tpu.matmul %136, %139, %cst_49 {dimension_numbers = #tpu.dot_dimension_numbers<[1], [0], [0], [1], [0, 0, 1, 1], [], []>} : vector<16x16xf32>, vector<16x32xf32>, vector<16x32xf32> -> vector<16x32xf32>
    %141 = tpu.reciprocal %138 {approx = true} : vector<16x1xf32> -> vector<16x1xf32>
    %142 = vector.broadcast %141 : vector<16x1xf32> to vector<16x32xf32>
    %143 = arith.mulf %140, %142 : vector<16x32xf32>
    %144 = vector.extract_strided_slice %118 {offsets = [0, 2], sizes = [16, 1], strides = [1, 1]} : vector<16x8xf32> to vector<16x1xf32>
    %145 = vector.extract_strided_slice %118 {offsets = [0, 3], sizes = [16, 1], strides = [1, 1]} : vector<16x8xf32> to vector<16x1xf32>
    %146 = tpu.transpose %144, [1, 0] : vector<16x1xf32> -> vector<1x16xf32>
    %147 = vector.broadcast %145 : vector<16x1xf32> to vector<16x16xf32>
    %148 = vector.broadcast %146 : vector<1x16xf32> to vector<16x16xf32>
    %149 = arith.addf %147, %148 : vector<16x16xf32>
    %cst_50 = arith.constant 0.000000e+00 : f32
    %150 = vector.broadcast %cst_50 : f32 to vector<16x16xf32>
    %151 = arith.cmpf ogt, %149, %150 : vector<16x16xf32>
    %cst_51 = arith.constant 2.000000e-01 : f32
    %152 = vector.broadcast %cst_51 : f32 to vector<16x16xf32>
    %153 = arith.mulf %152, %149 : vector<16x16xf32>
    %154 = arith.select %151, %149, %153 : vector<16x16xi1>, vector<16x16xf32>
    %cst_52 = arith.constant -1.000000e+30 : f32
    %155 = vector.broadcast %cst_52 : f32 to vector<16x16xf32>
    %156 = arith.select %2, %154, %155 : vector<16x16xi1>, vector<16x16xf32>
    %cst_53 = arith.constant dense<0xFF800000> : vector<16xf32>
    %157 = vector.multi_reduction <maximumf>, %156, %cst_53 [1] : vector<16x16xf32> to vector<16xf32>
    %158 = vector.shape_cast %157 : vector<16xf32> to vector<16x1xf32>
    %159 = vector.broadcast %158 : vector<16x1xf32> to vector<16x16xf32>
    %160 = arith.subf %156, %159 : vector<16x16xf32>
    %161 = math.exp %160 : vector<16x16xf32>
    %cst_54 = arith.constant dense<0.000000e+00> : vector<16xf32>
    %162 = vector.multi_reduction <add>, %161, %cst_54 [1] : vector<16x16xf32> to vector<16xf32>
    %163 = vector.shape_cast %162 : vector<16xf32> to vector<16x1xf32>
    %164 = vector.extract_strided_slice %117 {offsets = [0, 32], sizes = [16, 32], strides = [1, 1]} : vector<16x128xf32> to vector<16x32xf32>
    %cst_55 = arith.constant dense<0.000000e+00> : vector<16x32xf32>
    %165 = tpu.matmul %161, %164, %cst_55 {dimension_numbers = #tpu.dot_dimension_numbers<[1], [0], [0], [1], [0, 0, 1, 1], [], []>} : vector<16x16xf32>, vector<16x32xf32>, vector<16x32xf32> -> vector<16x32xf32>
    %166 = tpu.reciprocal %163 {approx = true} : vector<16x1xf32> -> vector<16x1xf32>
    %167 = vector.broadcast %166 : vector<16x1xf32> to vector<16x32xf32>
    %168 = arith.mulf %165, %167 : vector<16x32xf32>
    %169 = vector.extract_strided_slice %118 {offsets = [0, 4], sizes = [16, 1], strides = [1, 1]} : vector<16x8xf32> to vector<16x1xf32>
    %170 = vector.extract_strided_slice %118 {offsets = [0, 5], sizes = [16, 1], strides = [1, 1]} : vector<16x8xf32> to vector<16x1xf32>
    %171 = tpu.transpose %169, [1, 0] : vector<16x1xf32> -> vector<1x16xf32>
    %172 = vector.broadcast %170 : vector<16x1xf32> to vector<16x16xf32>
    %173 = vector.broadcast %171 : vector<1x16xf32> to vector<16x16xf32>
    %174 = arith.addf %172, %173 : vector<16x16xf32>
    %cst_56 = arith.constant 0.000000e+00 : f32
    %175 = vector.broadcast %cst_56 : f32 to vector<16x16xf32>
    %176 = arith.cmpf ogt, %174, %175 : vector<16x16xf32>
    %cst_57 = arith.constant 2.000000e-01 : f32
    %177 = vector.broadcast %cst_57 : f32 to vector<16x16xf32>
    %178 = arith.mulf %177, %174 : vector<16x16xf32>
    %179 = arith.select %176, %174, %178 : vector<16x16xi1>, vector<16x16xf32>
    %cst_58 = arith.constant -1.000000e+30 : f32
    %180 = vector.broadcast %cst_58 : f32 to vector<16x16xf32>
    %181 = arith.select %2, %179, %180 : vector<16x16xi1>, vector<16x16xf32>
    %cst_59 = arith.constant dense<0xFF800000> : vector<16xf32>
    %182 = vector.multi_reduction <maximumf>, %181, %cst_59 [1] : vector<16x16xf32> to vector<16xf32>
    %183 = vector.shape_cast %182 : vector<16xf32> to vector<16x1xf32>
    %184 = vector.broadcast %183 : vector<16x1xf32> to vector<16x16xf32>
    %185 = arith.subf %181, %184 : vector<16x16xf32>
    %186 = math.exp %185 : vector<16x16xf32>
    %cst_60 = arith.constant dense<0.000000e+00> : vector<16xf32>
    %187 = vector.multi_reduction <add>, %186, %cst_60 [1] : vector<16x16xf32> to vector<16xf32>
    %188 = vector.shape_cast %187 : vector<16xf32> to vector<16x1xf32>
    %189 = vector.extract_strided_slice %117 {offsets = [0, 64], sizes = [16, 32], strides = [1, 1]} : vector<16x128xf32> to vector<16x32xf32>
    %cst_61 = arith.constant dense<0.000000e+00> : vector<16x32xf32>
    %190 = tpu.matmul %186, %189, %cst_61 {dimension_numbers = #tpu.dot_dimension_numbers<[1], [0], [0], [1], [0, 0, 1, 1], [], []>} : vector<16x16xf32>, vector<16x32xf32>, vector<16x32xf32> -> vector<16x32xf32>
    %191 = tpu.reciprocal %188 {approx = true} : vector<16x1xf32> -> vector<16x1xf32>
    %192 = vector.broadcast %191 : vector<16x1xf32> to vector<16x32xf32>
    %193 = arith.mulf %190, %192 : vector<16x32xf32>
    %194 = vector.extract_strided_slice %118 {offsets = [0, 6], sizes = [16, 1], strides = [1, 1]} : vector<16x8xf32> to vector<16x1xf32>
    %195 = vector.extract_strided_slice %118 {offsets = [0, 7], sizes = [16, 1], strides = [1, 1]} : vector<16x8xf32> to vector<16x1xf32>
    %196 = tpu.transpose %194, [1, 0] : vector<16x1xf32> -> vector<1x16xf32>
    %197 = vector.broadcast %195 : vector<16x1xf32> to vector<16x16xf32>
    %198 = vector.broadcast %196 : vector<1x16xf32> to vector<16x16xf32>
    %199 = arith.addf %197, %198 : vector<16x16xf32>
    %cst_62 = arith.constant 0.000000e+00 : f32
    %200 = vector.broadcast %cst_62 : f32 to vector<16x16xf32>
    %201 = arith.cmpf ogt, %199, %200 : vector<16x16xf32>
    %cst_63 = arith.constant 2.000000e-01 : f32
    %202 = vector.broadcast %cst_63 : f32 to vector<16x16xf32>
    %203 = arith.mulf %202, %199 : vector<16x16xf32>
    %204 = arith.select %201, %199, %203 : vector<16x16xi1>, vector<16x16xf32>
    %cst_64 = arith.constant -1.000000e+30 : f32
    %205 = vector.broadcast %cst_64 : f32 to vector<16x16xf32>
    %206 = arith.select %2, %204, %205 : vector<16x16xi1>, vector<16x16xf32>
    %cst_65 = arith.constant dense<0xFF800000> : vector<16xf32>
    %207 = vector.multi_reduction <maximumf>, %206, %cst_65 [1] : vector<16x16xf32> to vector<16xf32>
    %208 = vector.shape_cast %207 : vector<16xf32> to vector<16x1xf32>
    %209 = vector.broadcast %208 : vector<16x1xf32> to vector<16x16xf32>
    %210 = arith.subf %206, %209 : vector<16x16xf32>
    %211 = math.exp %210 : vector<16x16xf32>
    %cst_66 = arith.constant dense<0.000000e+00> : vector<16xf32>
    %212 = vector.multi_reduction <add>, %211, %cst_66 [1] : vector<16x16xf32> to vector<16xf32>
    %213 = vector.shape_cast %212 : vector<16xf32> to vector<16x1xf32>
    %214 = vector.extract_strided_slice %117 {offsets = [0, 96], sizes = [16, 32], strides = [1, 1]} : vector<16x128xf32> to vector<16x32xf32>
    %cst_67 = arith.constant dense<0.000000e+00> : vector<16x32xf32>
    %215 = tpu.matmul %211, %214, %cst_67 {dimension_numbers = #tpu.dot_dimension_numbers<[1], [0], [0], [1], [0, 0, 1, 1], [], []>} : vector<16x16xf32>, vector<16x32xf32>, vector<16x32xf32> -> vector<16x32xf32>
    %216 = tpu.reciprocal %213 {approx = true} : vector<16x1xf32> -> vector<16x1xf32>
    %217 = vector.broadcast %216 : vector<16x1xf32> to vector<16x32xf32>
    %218 = arith.mulf %215, %217 : vector<16x32xf32>
    %219 = tpu.concatenate %143, %168, %193, %218 in 1 : vector<16x32xf32>, vector<16x32xf32>, vector<16x32xf32>, vector<16x32xf32> -> vector<16x128xf32>
    %220 = vector.broadcast %116 : vector<1x128xf32> to vector<16x128xf32>
    %221 = arith.addf %219, %220 : vector<16x128xf32>
    %cst_68 = arith.constant 0.000000e+00 : f32
    %222 = vector.broadcast %cst_68 : f32 to vector<16x128xf32>
    %223 = arith.maximumf %221, %222 : vector<16x128xf32>
    %c0_69 = arith.constant 0 : index
    %c0_70 = arith.constant 0 : index
    %224 = vector.load %arg8[%c0_69, %c0_70] : memref<128x64xf32, #tpu.memory_space<vmem>>, vector<128x64xf32>
    %c0_71 = arith.constant 0 : index
    %c0_72 = arith.constant 0 : index
    %225 = vector.load %arg9[%c0_71, %c0_72] : memref<64x4xf32, #tpu.memory_space<vmem>>, vector<64x4xf32>
    %c0_73 = arith.constant 0 : index
    %c0_74 = arith.constant 0 : index
    %226 = vector.load %arg10[%c0_73, %c0_74] : memref<1x64xf32, #tpu.memory_space<vmem>>, vector<1x64xf32>
    %cst_75 = arith.constant dense<0.000000e+00> : vector<16x64xf32>
    %227 = tpu.matmul %223, %224, %cst_75 {dimension_numbers = #tpu.dot_dimension_numbers<[1], [0], [0], [1], [0, 0, 1, 1], [], []>} : vector<16x128xf32>, vector<128x64xf32>, vector<16x64xf32> -> vector<16x64xf32>
    %cst_76 = arith.constant dense<0.000000e+00> : vector<16x4xf32>
    %228 = tpu.matmul %227, %225, %cst_76 {dimension_numbers = #tpu.dot_dimension_numbers<[1], [0], [0], [1], [0, 0, 1, 1], [], []>} : vector<16x64xf32>, vector<64x4xf32>, vector<16x4xf32> -> vector<16x4xf32>
    %229 = vector.extract_strided_slice %228 {offsets = [0, 0], sizes = [16, 1], strides = [1, 1]} : vector<16x4xf32> to vector<16x1xf32>
    %230 = vector.extract_strided_slice %228 {offsets = [0, 1], sizes = [16, 1], strides = [1, 1]} : vector<16x4xf32> to vector<16x1xf32>
    %231 = tpu.transpose %229, [1, 0] : vector<16x1xf32> -> vector<1x16xf32>
    %232 = vector.broadcast %230 : vector<16x1xf32> to vector<16x16xf32>
    %233 = vector.broadcast %231 : vector<1x16xf32> to vector<16x16xf32>
    %234 = arith.addf %232, %233 : vector<16x16xf32>
    %cst_77 = arith.constant 0.000000e+00 : f32
    %235 = vector.broadcast %cst_77 : f32 to vector<16x16xf32>
    %236 = arith.cmpf ogt, %234, %235 : vector<16x16xf32>
    %cst_78 = arith.constant 2.000000e-01 : f32
    %237 = vector.broadcast %cst_78 : f32 to vector<16x16xf32>
    %238 = arith.mulf %237, %234 : vector<16x16xf32>
    %239 = arith.select %236, %234, %238 : vector<16x16xi1>, vector<16x16xf32>
    %cst_79 = arith.constant -1.000000e+30 : f32
    %240 = vector.broadcast %cst_79 : f32 to vector<16x16xf32>
    %241 = arith.select %2, %239, %240 : vector<16x16xi1>, vector<16x16xf32>
    %cst_80 = arith.constant dense<0xFF800000> : vector<16xf32>
    %242 = vector.multi_reduction <maximumf>, %241, %cst_80 [1] : vector<16x16xf32> to vector<16xf32>
    %243 = vector.shape_cast %242 : vector<16xf32> to vector<16x1xf32>
    %244 = vector.broadcast %243 : vector<16x1xf32> to vector<16x16xf32>
    %245 = arith.subf %241, %244 : vector<16x16xf32>
    %246 = math.exp %245 : vector<16x16xf32>
    %cst_81 = arith.constant dense<0.000000e+00> : vector<16xf32>
    %247 = vector.multi_reduction <add>, %246, %cst_81 [1] : vector<16x16xf32> to vector<16xf32>
    %248 = vector.shape_cast %247 : vector<16xf32> to vector<16x1xf32>
    %249 = vector.extract_strided_slice %227 {offsets = [0, 0], sizes = [16, 32], strides = [1, 1]} : vector<16x64xf32> to vector<16x32xf32>
    %cst_82 = arith.constant dense<0.000000e+00> : vector<16x32xf32>
    %250 = tpu.matmul %246, %249, %cst_82 {dimension_numbers = #tpu.dot_dimension_numbers<[1], [0], [0], [1], [0, 0, 1, 1], [], []>} : vector<16x16xf32>, vector<16x32xf32>, vector<16x32xf32> -> vector<16x32xf32>
    %251 = tpu.reciprocal %248 {approx = true} : vector<16x1xf32> -> vector<16x1xf32>
    %252 = vector.broadcast %251 : vector<16x1xf32> to vector<16x32xf32>
    %253 = arith.mulf %250, %252 : vector<16x32xf32>
    %254 = vector.extract_strided_slice %228 {offsets = [0, 2], sizes = [16, 1], strides = [1, 1]} : vector<16x4xf32> to vector<16x1xf32>
    %255 = vector.extract_strided_slice %228 {offsets = [0, 3], sizes = [16, 1], strides = [1, 1]} : vector<16x4xf32> to vector<16x1xf32>
    %256 = tpu.transpose %254, [1, 0] : vector<16x1xf32> -> vector<1x16xf32>
    %257 = vector.broadcast %255 : vector<16x1xf32> to vector<16x16xf32>
    %258 = vector.broadcast %256 : vector<1x16xf32> to vector<16x16xf32>
    %259 = arith.addf %257, %258 : vector<16x16xf32>
    %cst_83 = arith.constant 0.000000e+00 : f32
    %260 = vector.broadcast %cst_83 : f32 to vector<16x16xf32>
    %261 = arith.cmpf ogt, %259, %260 : vector<16x16xf32>
    %cst_84 = arith.constant 2.000000e-01 : f32
    %262 = vector.broadcast %cst_84 : f32 to vector<16x16xf32>
    %263 = arith.mulf %262, %259 : vector<16x16xf32>
    %264 = arith.select %261, %259, %263 : vector<16x16xi1>, vector<16x16xf32>
    %cst_85 = arith.constant -1.000000e+30 : f32
    %265 = vector.broadcast %cst_85 : f32 to vector<16x16xf32>
    %266 = arith.select %2, %264, %265 : vector<16x16xi1>, vector<16x16xf32>
    %cst_86 = arith.constant dense<0xFF800000> : vector<16xf32>
    %267 = vector.multi_reduction <maximumf>, %266, %cst_86 [1] : vector<16x16xf32> to vector<16xf32>
    %268 = vector.shape_cast %267 : vector<16xf32> to vector<16x1xf32>
    %269 = vector.broadcast %268 : vector<16x1xf32> to vector<16x16xf32>
    %270 = arith.subf %266, %269 : vector<16x16xf32>
    %271 = math.exp %270 : vector<16x16xf32>
    %cst_87 = arith.constant dense<0.000000e+00> : vector<16xf32>
    %272 = vector.multi_reduction <add>, %271, %cst_87 [1] : vector<16x16xf32> to vector<16xf32>
    %273 = vector.shape_cast %272 : vector<16xf32> to vector<16x1xf32>
    %274 = vector.extract_strided_slice %227 {offsets = [0, 32], sizes = [16, 32], strides = [1, 1]} : vector<16x64xf32> to vector<16x32xf32>
    %cst_88 = arith.constant dense<0.000000e+00> : vector<16x32xf32>
    %275 = tpu.matmul %271, %274, %cst_88 {dimension_numbers = #tpu.dot_dimension_numbers<[1], [0], [0], [1], [0, 0, 1, 1], [], []>} : vector<16x16xf32>, vector<16x32xf32>, vector<16x32xf32> -> vector<16x32xf32>
    %276 = tpu.reciprocal %273 {approx = true} : vector<16x1xf32> -> vector<16x1xf32>
    %277 = vector.broadcast %276 : vector<16x1xf32> to vector<16x32xf32>
    %278 = arith.mulf %275, %277 : vector<16x32xf32>
    %279 = tpu.concatenate %253, %278 in 1 : vector<16x32xf32>, vector<16x32xf32> -> vector<16x64xf32>
    %280 = vector.broadcast %226 : vector<1x64xf32> to vector<16x64xf32>
    %281 = arith.addf %279, %280 : vector<16x64xf32>
    %cst_89 = arith.constant 0.000000e+00 : f32
    %282 = vector.broadcast %cst_89 : f32 to vector<16x64xf32>
    %283 = arith.maximumf %281, %282 : vector<16x64xf32>
    %c0_90 = arith.constant 0 : index
    %c0_91 = arith.constant 0 : index
    %284 = vector.load %arg11[%c0_90, %c0_91] : memref<64x32xf32, #tpu.memory_space<vmem>>, vector<64x32xf32>
    %c0_92 = arith.constant 0 : index
    %c0_93 = arith.constant 0 : index
    %285 = vector.load %arg12[%c0_92, %c0_93] : memref<1x32xf32, #tpu.memory_space<vmem>>, vector<1x32xf32>
    %c0_94 = arith.constant 0 : index
    %c0_95 = arith.constant 0 : index
    %286 = vector.load %arg13[%c0_94, %c0_95] : memref<32x64xf32, #tpu.memory_space<vmem>>, vector<32x64xf32>
    %c0_96 = arith.constant 0 : index
    %c0_97 = arith.constant 0 : index
    %287 = vector.load %arg14[%c0_96, %c0_97] : memref<1x64xf32, #tpu.memory_space<vmem>>, vector<1x64xf32>
    %cst_98 = arith.constant dense<0.000000e+00> : vector<16x32xf32>
    %288 = tpu.matmul %283, %284, %cst_98 {dimension_numbers = #tpu.dot_dimension_numbers<[1], [0], [0], [1], [0, 0, 1, 1], [], []>} : vector<16x64xf32>, vector<64x32xf32>, vector<16x32xf32> -> vector<16x32xf32>
    %289 = vector.broadcast %285 : vector<1x32xf32> to vector<16x32xf32>
    %290 = arith.addf %288, %289 : vector<16x32xf32>
    %cst_99 = arith.constant 0.000000e+00 : f32
    %291 = vector.broadcast %cst_99 : f32 to vector<16x32xf32>
    %292 = arith.maximumf %290, %291 : vector<16x32xf32>
    %cst_100 = arith.constant dense<0.000000e+00> : vector<16x64xf32>
    %293 = tpu.matmul %292, %286, %cst_100 {dimension_numbers = #tpu.dot_dimension_numbers<[1], [0], [0], [1], [0, 0, 1, 1], [], []>} : vector<16x32xf32>, vector<32x64xf32>, vector<16x64xf32> -> vector<16x64xf32>
    %294 = vector.broadcast %287 : vector<1x64xf32> to vector<16x64xf32>
    %295 = arith.addf %293, %294 : vector<16x64xf32>
    %c0_101 = arith.constant 0 : index
    %c0_102 = arith.constant 0 : index
    %296 = vector.load %arg15[%c0_101, %c0_102] : memref<16x64xf32, #tpu.memory_space<vmem>>, vector<16x64xf32>
    tpu.vector_store %arg15[%c0_101, %c0_102], %295 {strides = array<i32>} : memref<16x64xf32, #tpu.memory_space<vmem>>, vector<16x64xf32>,
    return
  }
}

</mosaic_0001>

<bundles_post_ra>
// kernel: tpu_custom_call.1
= control target key start
LH: loop header
LB: loop body
LE: loop exit
PB: predicated region body
PF: predicated region fallthrough
CT: control target
= control target key end

     0   :  { %vm76_vm0 = vcmask 130048   ;;  %s4039_s0 = inlined_call_operand.vmem [shape: f32[16,16], index: 0, kind: input, shape index: {}]   ;;  %s4040_s1 = inlined_call_operand.vmem [shape: f32[16,16], index: 1, kind: input, shape index: {}]   ;;  %s4041_s2 = inlined_call_operand.vmem [shape: f32[16,128], index: 2, kind: input, shape index: {}]   ;;  %s4042_s3 = inlined_call_operand.vmem [shape: f32[128,8], index: 3, kind: input, shape index: {}]   ;;  %s4043_s4 = inlined_call_operand.vmem [shape: f32[1,128], index: 4, kind: input, shape index: {}]   ;;  %s4044_s5 = inlined_call_operand.vmem [shape: f32[128,128], index: 5, kind: input, shape index: {}]   ;;  %s4045_s6 = inlined_call_operand.vmem [shape: f32[128,8], index: 6, kind: input, shape index: {}]   ;;  %s4046_s7 = inlined_call_operand.vmem [shape: f32[1,128], index: 7, kind: input, shape index: {}]   ;;  %s4047_s8 = inlined_call_operand.vmem [shape: f32[128,64], index: 8, kind: input, shape index: {}]   ;;  %s4048_s9 = inlined_call_operand.vmem [shape: f32[64,4], index: 9, kind: input, shape index: {}]   ;;  %s4049_s10 = inlined_call_operand.vmem [shape: f32[1,64], index: 10, kind: input, shape index: {}]   ;;  %s4050_s11 = inlined_call_operand.vmem [shape: f32[64,32], index: 11, kind: input, shape index: {}]   ;;  %s4051_s12 = inlined_call_operand.vmem [shape: f32[1,32], index: 12, kind: input, shape index: {}]   ;;  %s4052_s13 = inlined_call_operand.vmem [shape: f32[32,64], index: 13, kind: input, shape index: {}]   ;;  %s4053_s14 = inlined_call_operand.vmem [shape: f32[1,64], index: 14, kind: input, shape index: {}]   ;;  %s4054_s15 = inlined_call_operand.hbm [shape: f32[16,64], index: 15, kind: output, shape index: {}]  }
   0x1   :  { %v57_v0 = vld [vmem:[%s4041_s2] sm:$0xff]  ;;  %v58_v1 = vld [vmem:[%s4041_s2 + $0x8] sm:$0xff]  ;;  %v61_v7 = vld [vmem:[%s4042_s3 + $0x10] sm:$0xff] }
   0x2   :  { %v55_v2 = vld [vmem:[%s4039_s0] sm:$0xff]  ;;  %v3013_v3 = vpack.c.bf16 %v58_v1, %v57_v0  ;;  %v60_v5 = vld [vmem:[%s4042_s3 + $0x8] sm:$0xff]  ;;  %v62_v8 = vld [vmem:[%s4042_s3 + $0x18] sm:$0xff] }
   0x3   :  { %2751 = vmatprep.mubr.msk.f32.mxu0 %vm76_vm0, %v55_v2  ;;  %v59_v4 = vld [vmem:[%s4042_s3] sm:$0xff]  ;;  %v3021_v9 = vpack.c.bf16 %v62_v8, %v61_v7  ;;  %v64_v11 = vld [vmem:[%s4042_s3 + $0x28] sm:$0xff] }
   0x4   :  { %v3017_v6 = vpack.c.bf16 %v60_v5, %v59_v4  ;;  %3014 = vmatprep.subr.bf16.mxu0 %v3013_v3  ;;  %v63_v10 = vld [vmem:[%s4042_s3 + $0x20] sm:$0xff]  ;;  %v56_v12 = vld [vmem:[%s4039_s0 + $0x8] sm:$0xff] }
   0x5   :  { %3016 = vmatpush3.bf16.msra.mxu0 %v3013_v3  ;;  %v3025_v13 = vpack.c.bf16 %v64_v11, %v63_v10 }
   0x6   :  { %3018 = vmatprep.subr.bf16.mxu1 %v3017_v6 }
   0x7   :  { %3020 = vmatpush3.bf16.msra.mxu1 %v3017_v6 }
   0x8   :  { %3022 = vmatprep.subr.bf16.mxu1 %v3021_v9 }
   0x9   :  { %20 = vsyncpa [#allocation3], 0  ;;  %2752 = vmatmul.mubr.msk.f32.vlgmr.msra.gmra.mrb[0].mxu0 %vm76_vm0, %v56_v12  ;;  %v65_v14 = vld [vmem:[%s4042_s3 + $0x30] sm:$0xff]  ;;  %v66_v15 = vld [vmem:[%s4042_s3 + $0x38] sm:$0xff]  ;;  %v3399_v33 = vmov 3   ;;  %v3400_v34 = vmov 1   ;;  %v275_v49 = vlaneseq }
   0xa   :  { %v3029_v16 = vpack.c.bf16 %v66_v15, %v65_v14  ;;  %v67_v17 = vld [vmem:[%s4042_s3 + $0x40] sm:$0xff]  ;;  %v68_v18 = vld [vmem:[%s4042_s3 + $0x48] sm:$0xff]  ;;  %v69_v20 = vld [vmem:[%s4042_s3 + $0x50] sm:$0xff]  ;;  %3240 = vset.pattern.permute.xlu0 %v3399_v33  ;;  %3239 = vset.pattern.permute.xlu1 %v3400_v34  ;;  %s3402_s25 = smov 126   ;;  %s3403_s26 = smov 122   ;;  %v3404_v37 = vmov 5  }
   0xb   :  { %3024 = vmatpush3.bf16.msra.mxu1 %v3021_v9  ;;  %v3033_v19 = vpack.c.bf16 %v68_v18, %v67_v17  ;;  %v70_v21 = vld [vmem:[%s4042_s3 + $0x58] sm:$0xff]  ;;  %v71_v23 = vld [vmem:[%s4042_s3 + $0x60] sm:$0xff]  ;;  %v72_v24 = vld [vmem:[%s4042_s3 + $0x68] sm:$0xff]  ;;  %v3405_v38 = vmov 7   ;;  %v276_v51 = vshrl.u32 %v275_v49, 7  ;;  %s3407_s2 = smov 96  }
   0xc   :  { %3026 = vmatprep.subr.bf16.mxu1 %v3025_v13  ;;  %v3037_v22 = vpack.c.bf16 %v70_v21, %v69_v20  ;;  %v3041_v25 = vpack.c.bf16 %v72_v24, %v71_v23  ;;  %v73_v26 = vld [vmem:[%s4042_s3 + $0x70] sm:$0xff]  ;;  %v74_v27 = vld [vmem:[%s4042_s3 + $0x78] sm:$0xff]  ;;  %s3401_s3 = smov 124   ;;  %v3580_v56 = vld [vmem:[%s4040_s1 + $0x8] sm:$0xff]  ;;  %s3408_s30 = smov 32   ;;  %vm925_vm11 = vcmask 261120  }
   0xd   :  { %v3045_v28 = vpack.c.bf16 %v74_v27, %v73_v26  ;;  %v3574_v53 = vsub.s32 0, %v276_v51  ;;  %v3585_v57 = vld [vmem:[%s4040_s1] sm:$0xff]  ;;  %vm54_vm1 = vcmp.gt.f32.partialorder %v3580_v56, 0.0  ;;  %s3406_s1 = smov 64   ;;  %vm928_vm12 = vcmask 523264  }
   0xe   :  { %vm53_vm2 = vcmp.gt.f32.partialorder %v3585_v57, 0.0  ;;  %vm931_vm13 = vcmask 785408  }
   0xf   :  { %3028 = vmatpush3.bf16.msra.mxu1 %v3025_v13 }
  0x10   :  { %3030 = vmatprep.subr.bf16.mxu1 %v3029_v16 }
  0x13   :  { %3032 = vmatpush3.bf16.msra.mxu1 %v3029_v16 }
  0x14   :  { %3034 = vmatprep.subr.bf16.mxu1 %v3033_v19 }
  0x17   :  { %3036 = vmatpush3.bf16.msra.mxu1 %v3033_v19 }
  0x18   :  { %3038 = vmatprep.subr.bf16.mxu1 %v3037_v22 }
  0x1b   :  { %3040 = vmatpush3.bf16.msra.mxu1 %v3037_v22 }
  0x1c   :  { %3042 = vmatprep.subr.bf16.mxu1 %v3041_v25 }
  0x1f   :  { %3044 = vmatpush3.bf16.msra.mxu1 %v3041_v25 }
  0x20   :  { %3046 = vmatprep.subr.bf16.mxu1 %v3045_v28 }
  0x23   :  { %3048 = vmatpush3.bf16.msra.mxu1 %v3045_v28 }
  0xdc   :  { %v2753_v29 = vpop.f32.mrb[0].mxu0 }
  0xdd   :  { %v149_v30 = vpop.f32.mrb[1].mxu0 }
  0xde   :  { %2786 = vmatprep.mubr.f32.mxu1 %v149_v30  ;;  %v3049_v31 = vpack.c.bf16 %v2753_v29, %v149_v30  ;;  %v3554_v32 = vpack.i.bf16 %v2753_v29, %v149_v30 }
  0xdf   :  { %2787 = vmatmul.mubr.f32.vlgmr.msra.gmra.mrb[0].mxu1 %v2753_v29 }
  0xe0   :  { %3050 = vmatprep.subr.bf16.mxu0 %v3049_v31 }
  0xe1   :  { %3052 = vmatpush3.bf16.msra.mxu0 %v3049_v31 }
 0x1b2   :  { %v2788_v35 = vpop.f32.mrb[0].mxu1 }
 0x1b3   :  { %565 = vrot.lane.b32.xlu1 %v2788_v35, %s3401_s3  ;;  %394 = vrot.lane.b32.xlu0 %v2788_v35, %s3402_s25  ;;  %v224_v36 = vpop.f32.mrb[1].mxu1 }
 0x1b7   :  { %734 = vrot.lane.b32.xlu1 %v2788_v35, %s3403_s26  ;;  %435 = vperm.xlu0 %3240, %v2788_v35  }
 0x1bb   :  { %272 = vperm.xlu1 %3239, %v2788_v35   ;;  %392 = vrot.lane.b32.xlu0 %v224_v36, %s3402_s25 }
 0x1bc   :  { %3243 = vset.pattern.permute.xlu0 %v3400_v34 }
 0x1bf   :  { %3241 = vset.pattern.permute.xlu1 %v3404_v37  ;;  %732 = vrot.lane.b32.xlu0 %v224_v36, %s3403_s26 }
 0x1c0   :  { %606 = vperm.xlu1 %3241, %v2788_v35  }
 0x1c3   :  { %267 = vperm.xlu0 %3243, %v224_v36  }
 0x1c4   :  { %3242 = vset.pattern.permute.xlu1 %v3405_v38 }
 0x1c5   :  { %775 = vperm.xlu1 %3242, %v2788_v35  }
 0x1c7   :  { %3246 = vset.pattern.permute.xlu0 %v3405_v38 }
 0x1c8   :  { %771 = vperm.xlu0 %3246, %v224_v36  }
 0x1c9   :  { %563 = vrot.lane.b32.xlu1 %v224_v36, %s3401_s3 }
 0x1ca   :  { %3244 = vset.pattern.permute.xlu1 %v3399_v33 }
 0x1cd   :  { %431 = vperm.xlu1 %3244, %v224_v36  }
 0x1d1   :  { %3245 = vset.pattern.permute.xlu1 %v3404_v37 }
 0x1d2   :  { %602 = vperm.xlu1 %3245, %v224_v36  }
 0x1fb   :  { %233 = vxpose.xlu1.b32.start [1/2] (short) (narrow) %v224_v36, 8 }
 0x1ff   :  { %234 = vxpose.xlu1.b32.end [2/2] (short) (narrow) %v2788_v35, 8 }
 0x225   :  { %v566_v39 = vpop.permute.xlu1 %565  ;;  %v395_v40 = vpop.permute.xlu0 %394 }
 0x229   :  { %v735_v41 = vpop.permute.xlu1 %734 }
 0x236   :  { %v436_v42 = vpop.permute.xlu0 %435 }
 0x23a   :  { %v273_v43 = vpop.permute.xlu1 %272  ;;  %v393_v44 = vpop.permute.xlu0 %392 }
 0x23b   :  { %398 = vxpose.xlu0.b32.start [1/2] (short) (narrow) %v393_v44, 8 }
 0x23e   :  { %v733_v45 = vpop.permute.xlu0 %732 }
 0x23f   :  { %v607_v46 = vpop.permute.xlu1 %606  ;;  %399 = vxpose.xlu0.b32.end [2/2] (short) (narrow) %v395_v40, 8  ;;  %738 = vxpose.xlu1.b32.start [1/2] (short) (narrow) %v733_v45, 8 }
 0x242   :  { %v268_v58 = vpop.permute.xlu0 %267 }
 0x243   :  { %739 = vxpose.xlu1.b32.end [2/2] (short) (narrow) %v735_v41, 8 }
 0x244   :  { %v3570_v47 = vpop.permute.xlu1 %775 }
 0x247   :  { %v772_v5 = vpop.permute.xlu0 %771 }
 0x248   :  { %v564_v48 = vpop.permute.xlu1 %563 }
 0x249   :  { %569 = vxpose.xlu0.b32.start [1/2] (short) (narrow) %v564_v48, 8 }
 0x24c   :  { %v432_v50 = vpop.permute.xlu1 %431 }
 0x24d   :  { %570 = vxpose.xlu0.b32.end [2/2] (short) (narrow) %v566_v39, 8 }
 0x251   :  { %v603_v52 = vpop.permute.xlu1 %602 }
 0x261   :  { %3262 = vset.pattern.permute.xlu1 %v3400_v34 }
 0x276   :  { %3263 = vset.pattern.permute.xlu0 %v3399_v33 }
 0x27b   :  { %v249_v54 = vpop.trf.xlu1 }
 0x27c   :  { %v278_v55 = vrot.slane %v249_v54, %v3574_v53 }
 0x27e   :  { %v279_v59 = vadd.f32 %v278_v55, %v268_v58  ;;  %v280_v60 = vadd.f32 %v278_v55, %v273_v43 }
 0x280   :  { %vm282_vm3 = vcmp.gt.f32.partialorder %v280_v60, 0.0  ;;  %v284_v61 = vmul.f32 0.2, %v280_v60  ;;  %vm281_vm4 = vcmp.gt.f32.partialorder %v279_v59, 0.0  ;;  %v283_v62 = vmul.f32 0.2, %v279_v59 }
 0x282   :  { %v286_v63 = vsel %vm282_vm3, %v280_v60, %v284_v61  ;;  %v285_v0 = vsel %vm281_vm4, %v279_v59, %v283_v62 }
 0x283   :  { %v3591_v1 = vsel %vm54_vm1, %v286_v63, -1e+30  ;;  %v3595_v2 = vsel %vm53_vm2, %v285_v0, -1e+30 }
 0x284   :  { %v292_v3 = vsel %vm76_vm0, %v3591_v1, -inf  ;;  %v289_v4 = vsel %vm76_vm0, %v3595_v2, -inf }
 0x285   :  { %293 = vmax.xlane.f32.xlu1 %v292_v3  ;;  %290 = vmax.xlane.f32.xlu0 %v289_v4 }
 0x2bb   :  { %v414_v6 = vpop.trf.xlu0 }
 0x2bc   :  { %v441_v7 = vrot.slane %v414_v6, %v3574_v53 }
 0x2be   :  { %v442_v8 = vadd.f32 %v441_v7, %v432_v50  ;;  %v443_v9 = vadd.f32 %v441_v7, %v436_v42 }
 0x2bf   :  { %v754_v11 = vpop.trf.xlu1 }
 0x2c0   :  { %vm445_vm5 = vcmp.gt.f32.partialorder %v443_v9, 0.0  ;;  %v447_v10 = vmul.f32 0.2, %v443_v9  ;;  %vm444_vm6 = vcmp.gt.f32.partialorder %v442_v8, 0.0  ;;  %v446_v12 = vmul.f32 0.2, %v442_v8 }
 0x2c1   :  { %v781_v16 = vrot.slane %v754_v11, %v3574_v53 }
 0x2c2   :  { %v449_v13 = vsel %vm445_vm5, %v443_v9, %v447_v10  ;;  %v448_v15 = vsel %vm444_vm6, %v442_v8, %v446_v12 }
 0x2c3   :  { %v451_v14 = vsel %vm54_vm1, %v449_v13, -1e+30  ;;  %v450_v18 = vsel %vm53_vm2, %v448_v15, -1e+30  ;;  %v782_v20 = vadd.f32 %v781_v16, %v772_v5  ;;  %v783_v42 = vadd.f32 %v781_v16, %v3570_v47 }
 0x2c4   :  { %v455_v17 = vsel %vm76_vm0, %v451_v14, -inf  ;;  %v452_v19 = vsel %vm76_vm0, %v450_v18, -inf }
 0x2c5   :  { %456 = vmax.xlane.f32.xlu1 %v455_v17  ;;  %453 = vmax.xlane.f32.xlu0 %v452_v19  ;;  %v786_v25 = vmul.f32 0.2, %v782_v20  ;;  %vm784_vm7 = vcmp.gt.f32.partialorder %v782_v20, 0.0  ;;  %v787_v43 = vmul.f32 0.2, %v783_v42  ;;  %vm785_vm10 = vcmp.gt.f32.partialorder %v783_v42, 0.0 }
 0x2c7   :  { %v788_v30 = vsel %vm784_vm7, %v782_v20, %v786_v25  ;;  %v789_v44 = vsel %vm785_vm10, %v783_v42, %v787_v43 }
 0x2c8   :  { %v790_v40 = vsel %vm53_vm2, %v788_v30, -1e+30  ;;  %v3626_v45 = vsel %vm54_vm1, %v789_v44, -1e+30 }
 0x2c9   :  { %v585_v21 = vpop.trf.xlu0  ;;  %v792_v41 = vsel %vm76_vm0, %v790_v40, -inf }
 0x2ca   :  { %v612_v22 = vrot.slane %v585_v21, %v3574_v53 }
 0x2cc   :  { %v613_v23 = vadd.f32 %v612_v22, %v603_v52  ;;  %v614_v24 = vadd.f32 %v612_v22, %v607_v46  ;;  %v795_v46 = vsel %vm76_vm0, %v3626_v45, -inf }
 0x2ce   :  { %vm616_vm8 = vcmp.gt.f32.partialorder %v614_v24, 0.0  ;;  %v618_v26 = vmul.f32 0.2, %v614_v24  ;;  %vm615_vm9 = vcmp.gt.f32.partialorder %v613_v23, 0.0  ;;  %v617_v27 = vmul.f32 0.2, %v613_v23 }
 0x2d0   :  { %v620_v28 = vsel %vm616_vm8, %v614_v24, %v618_v26  ;;  %v619_v29 = vsel %vm615_vm9, %v613_v23, %v617_v27 }
 0x2d1   :  { %v622_v31 = vsel %vm54_vm1, %v620_v28, -1e+30  ;;  %v621_v35 = vsel %vm53_vm2, %v619_v29, -1e+30 }
 0x2d2   :  { %v626_v36 = vsel %vm76_vm0, %v622_v31, -inf  ;;  %v623_v39 = vsel %vm76_vm0, %v621_v35, -inf }
 0x2d3   :  { %627 = vmax.xlane.f32.xlu1 %v626_v36  ;;  %624 = vmax.xlane.f32.xlu0 %v623_v39 }
 0x2d7   :  { %793 = vmax.xlane.f32.xlu0 %v792_v41 }
 0x2e4   :  { %3253 = vrot.lane.b32.xlu1 %v3554_v32, %s3406_s1 }
 0x2ed   :  { %3248 = vrot.lane.b32.xlu0 %v3554_v32, %s3407_s2 }
 0x308   :  { %796 = vmax.xlane.f32.xlu1 %v795_v46 }
 0x312   :  { %v294_v48 = vpop.xlane.xlu1 %293  ;;  %v291_v49 = vpop.xlane.xlu0 %290 }
 0x313   :  { %v296_v50 = vsub.f32 %v3591_v1, %v294_v48  ;;  %v295_v51 = vsub.f32 %v3595_v2, %v291_v49  ;;  %v944_v49 = vld [vmem:[%s4044_s5] sm:$0xff] }
 0x315   :  { %v299_v52 = vmul.f32 1.442695, %v296_v50  ;;  %v297_v54 = vmul.f32 1.442695, %v295_v51  ;;  %v945_v50 = vld [vmem:[%s4044_s5 + $0x8] sm:$0xff]  ;;  %v946_v51 = vld [vmem:[%s4044_s5 + $0x10] sm:$0xff] }
 0x317   :  { %3295 = vpow2.f32 %v299_v52 }
 0x318   :  { %3297 = vpow2.f32 %v297_v54 }
 0x319   :  { %3258 = vrot.lane.b32.xlu1 %v3554_v32, %s3408_s30 }
 0x321   :  { %v3634_v47 = vpop.eup %3295 }
 0x322   :  { %v3298_v55 = vpop.eup %3297  ;;  %v304_v41 = vsel %vm76_vm0, %v3634_v47, 0.0 }
 0x323   :  { %2793 = vmatprep.mubr.msk.f32.mxu0 %vm76_vm0, %v3298_v55  ;;  %v301_v26 = vsel %vm76_vm0, %v3298_v55, 0.0  ;;  %v947_v55 = vld [vmem:[%s4044_s5 + $0x18] sm:$0xff] }
 0x324   :  { %2794 = vmatmul.mubr.msk.f32.vlgmr.msra.gmra.mrb[2].mxu0 %vm76_vm0, %v3634_v47  ;;  %v3065_v47 = vpack.c.bf16 %v945_v50, %v944_v49  ;;  %v968_v50 = vld [vmem:[%s4045_s6 + $0x40] sm:$0xff] }
 0x352   :  { %v457_v58 = vpop.xlane.xlu1 %456  ;;  %v454_v60 = vpop.xlane.xlu0 %453 }
 0x353   :  { %v459_v59 = vsub.f32 %v451_v14, %v457_v58  ;;  %v458_v61 = vsub.f32 %v450_v18, %v454_v60 }
 0x355   :  { %v462_v62 = vmul.f32 1.442695, %v459_v59  ;;  %v460_v63 = vmul.f32 1.442695, %v458_v61  ;;  %v3069_v61 = vpack.c.bf16 %v947_v55, %v946_v51  ;;  %v969_v51 = vld [vmem:[%s4045_s6 + $0x48] sm:$0xff] }
 0x357   :  { %3299 = vpow2.f32 %v462_v62  ;;  %v948_v62 = vld [vmem:[%s4044_s5 + $0x20] sm:$0xff] }
 0x358   :  { %3301 = vpow2.f32 %v460_v63  ;;  %v949_v63 = vld [vmem:[%s4044_s5 + $0x28] sm:$0xff] }
 0x360   :  { %v628_v0 = vpop.xlane.xlu1 %627  ;;  %v625_v1 = vpop.xlane.xlu0 %624 }
 0x361   :  { %v3300_v2 = vpop.eup %3299  ;;  %v630_v32 = vsub.f32 %v622_v31, %v628_v0  ;;  %v629_v3 = vsub.f32 %v621_v35, %v625_v1 }
 0x362   :  { %v3302_v4 = vpop.eup %3301  ;;  %v467_v5 = vsel %vm76_vm0, %v3300_v2, 0.0 }
 0x363   :  { %v631_v6 = vmul.f32 1.442695, %v629_v3  ;;  %2800 = vmatprep.mubr.msk.f32.mxu0 %vm76_vm0, %v3302_v4  ;;  %468 = vadd.xlane.f32.xlu1 %v467_v5  ;;  %v464_v7 = vsel %vm76_vm0, %v3302_v4, 0.0  ;;  %v633_v8 = vmul.f32 1.442695, %v630_v32  ;;  %v3073_v32 = vpack.c.bf16 %v949_v63, %v948_v62  ;;  %v950_v5 = vld [vmem:[%s4044_s5 + $0x30] sm:$0xff] }
 0x364   :  { %465 = vadd.xlane.f32.xlu0 %v464_v7  ;;  %v794_v9 = vpop.xlane.xlu0 %793  ;;  %v3254_v10 = vpop.permute.xlu1 %3253  ;;  %v975_v62 = vld [vmem:[%s4045_s6 + $0x78] sm:$0xff] }
 0x365   :  { %v798_v11 = vsub.f32 %v790_v40, %v794_v9  ;;  %3303 = vpow2.f32 %v631_v6  ;;  %v3256_v13 = vunpack.i.h.bf16 %v3254_v10  ;;  %v3255_v15 = vunpack.i.l.bf16 %v3254_v10  ;;  %v951_v6 = vld [vmem:[%s4044_s5 + $0x38] sm:$0xff]  ;;  %v952_v9 = vld [vmem:[%s4044_s5 + $0x40] sm:$0xff]  ;;  %v953_v10 = vld [vmem:[%s4044_s5 + $0x48] sm:$0xff] }
 0x366   :  { %3305 = vpow2.f32 %v633_v8  ;;  %v3077_v7 = vpack.c.bf16 %v951_v6, %v950_v5 }
 0x367   :  { %v800_v12 = vmul.f32 1.442695, %v798_v11  ;;  %v3057_v19 = vpack.c.bf16 %v3256_v13, %v3255_v15  ;;  %v954_v13 = vld [vmem:[%s4044_s5 + $0x50] sm:$0xff] }
 0x368   :  { %v3249_v14 = vpop.permute.xlu0 %3248 }
 0x369   :  { %3307 = vpow2.f32 %v800_v12  ;;  %v3251_v16 = vunpack.i.h.bf16 %v3249_v14  ;;  %v3250_v17 = vunpack.i.l.bf16 %v3249_v14  ;;  %v3081_v12 = vpack.c.bf16 %v953_v10, %v952_v9  ;;  %v955_v14 = vld [vmem:[%s4044_s5 + $0x58] sm:$0xff]  ;;  %v2582_v10 = vld [vmem:[%s4043_s4] ss:$0 sm:$0xff] }
 0x36a   :  { %v3085_v15 = vpack.c.bf16 %v955_v14, %v954_v13 }
 0x36b   :  { %v3053_v18 = vpack.c.bf16 %v3251_v16, %v3250_v17  ;;  %v956_v16 = vld [vmem:[%s4044_s5 + $0x60] sm:$0xff]  ;;  %v957_v17 = vld [vmem:[%s4044_s5 + $0x68] sm:$0xff] }
 0x36d   :  { %3054 = vmatprep.subr.bf16.mxu0 %v3053_v18 }
 0x36e   :  { %3056 = vmatpush3.bf16.msra.mxu0 %v3053_v18  ;;  %v3089_v18 = vpack.c.bf16 %v957_v17, %v956_v16 }
 0x36f   :  { %3058 = vmatprep.subr.bf16.mxu0 %v3057_v19  ;;  %v3304_v20 = vpop.eup %3303 }
 0x370   :  { %v635_v21 = vsel %vm76_vm0, %v3304_v20, 0.0  ;;  %v3306_v22 = vpop.eup %3305 }
 0x371   :  { %2801 = vmatmul.mubr.msk.f32.vlgmr.msra.gmra.mrb[4].mxu0 %vm76_vm0, %v3300_v2  ;;  %636 = vadd.xlane.f32.xlu0 %v635_v21  ;;  %v638_v25 = vsel %vm76_vm0, %v3306_v22, 0.0  ;;  %v958_v21 = vld [vmem:[%s4044_s5 + $0x70] sm:$0xff] }
 0x372   :  { %3060 = vmatpush3.bf16.msra.mxu0 %v3057_v19  ;;  %2807 = vmatprep.mubr.msk.f32.mxu0 %vm76_vm0, %v3304_v20 }
 0x373   :  { %v3308_v23 = vpop.eup %3307 }
 0x374   :  { %v804_v24 = vsel %vm76_vm0, %v3308_v23, 0.0 }
 0x375   :  { %805 = vadd.xlane.f32.xlu1 %v804_v24  ;;  %2808 = vmatmul.mubr.msk.f32.vlgmr.msra.gmra.mrb[6].mxu0 %vm76_vm0, %v3306_v22  ;;  %v959_v22 = vld [vmem:[%s4044_s5 + $0x78] sm:$0xff]  ;;  %v960_v24 = vld [vmem:[%s4045_s6] sm:$0xff] }
 0x376   :  { %639 = vadd.xlane.f32.xlu0 %v638_v25  ;;  %2814 = vmatprep.mubr.msk.f32.mxu0 %vm76_vm0, %v3308_v23  ;;  %v3093_v23 = vpack.c.bf16 %v959_v22, %v958_v21  ;;  %v961_v25 = vld [vmem:[%s4045_s6 + $0x8] sm:$0xff] }
 0x379   :  { %302 = vadd.xlane.f32.xlu1 %v301_v26  ;;  %v962_v26 = vld [vmem:[%s4045_s6 + $0x10] sm:$0xff] }
 0x395   :  { %v797_v27 = vpop.xlane.xlu1 %796 }
 0x396   :  { %v799_v28 = vsub.f32 %v3626_v45, %v797_v27  ;;  %v3097_v27 = vpack.c.bf16 %v961_v25, %v960_v24 }
 0x398   :  { %v802_v29 = vmul.f32 1.442695, %v799_v28  ;;  %v963_v28 = vld [vmem:[%s4045_s6 + $0x18] sm:$0xff]  ;;  %3098 = vmatprep.subr.bf16.mxu1 %v3097_v27 }
 0x399   :  { %v3259_v30 = vpop.permute.xlu1 %3258  ;;  %3100 = vmatpush3.bf16.msra.mxu1 %v3097_v27 }
 0x39a   :  { %3309 = vpow2.f32 %v802_v29  ;;  %v3261_v31 = vunpack.i.h.bf16 %v3259_v30  ;;  %v3260_v35 = vunpack.i.l.bf16 %v3259_v30  ;;  %v3101_v29 = vpack.c.bf16 %v963_v28, %v962_v26  ;;  %v964_v30 = vld [vmem:[%s4045_s6 + $0x20] sm:$0xff] }
 0x39c   :  { %v3061_v36 = vpack.c.bf16 %v3261_v31, %v3260_v35  ;;  %v965_v31 = vld [vmem:[%s4045_s6 + $0x28] sm:$0xff]  ;;  %3102 = vmatprep.subr.bf16.mxu1 %v3101_v29 }
 0x39d   :  { %3104 = vmatpush3.bf16.msra.mxu1 %v3101_v29 }
 0x39e   :  { %3062 = vmatprep.subr.bf16.mxu0 %v3061_v36 }
 0x39f   :  { %3064 = vmatpush3.bf16.msra.mxu0 %v3061_v36 }
 0x3a0   :  { %3066 = vmatprep.subr.bf16.mxu0 %v3065_v47 }
 0x3a4   :  { %v3310_v39 = vpop.eup %3309 }
 0x3a5   :  { %2815 = vmatmul.mubr.msk.f32.vlgmr.msra.gmra.mrb[8].mxu0 %vm76_vm0, %v3310_v39  ;;  %v807_v40 = vsel %vm76_vm0, %v3310_v39, 0.0 }
 0x3a6   :  { %808 = vadd.xlane.f32.xlu0 %v807_v40  ;;  %3068 = vmatpush3.bf16.msra.mxu0 %v3065_v47  ;;  %v971_v47 = vld [vmem:[%s4045_s6 + $0x58] sm:$0xff] }
 0x3a7   :  { %3070 = vmatprep.subr.bf16.mxu0 %v3069_v61 }
 0x3aa   :  { %305 = vadd.xlane.f32.xlu0 %v304_v41  ;;  %3072 = vmatpush3.bf16.msra.mxu0 %v3069_v61  ;;  %v974_v61 = vld [vmem:[%s4045_s6 + $0x70] sm:$0xff] }
 0x3ab   :  { %3074 = vmatprep.subr.bf16.mxu0 %v3073_v32  ;;  %v3125_v63 = vpack.c.bf16 %v975_v62, %v974_v61 }
 0x3ae   :  { %3076 = vmatpush3.bf16.msra.mxu0 %v3073_v32 }
 0x3af   :  { %3078 = vmatprep.subr.bf16.mxu0 %v3077_v7 }
 0x3b2   :  { %3080 = vmatpush3.bf16.msra.mxu0 %v3077_v7 }
 0x3b3   :  { %3082 = vmatprep.subr.bf16.mxu0 %v3081_v12 }
 0x3b6   :  { %3084 = vmatpush3.bf16.msra.mxu0 %v3081_v12 }
 0x3b7   :  { %3086 = vmatprep.subr.bf16.mxu0 %v3085_v15 }
 0x3ba   :  { %3088 = vmatpush3.bf16.msra.mxu0 %v3085_v15 }
 0x3bb   :  { %3090 = vmatprep.subr.bf16.mxu0 %v3089_v18 }
 0x3be   :  { %3092 = vmatpush3.bf16.msra.mxu0 %v3089_v18 }
 0x3bf   :  { %3094 = vmatprep.subr.bf16.mxu0 %v3093_v23 }
 0x3c2   :  { %3096 = vmatpush3.bf16.msra.mxu0 %v3093_v23 }
 0x3f0   :  { %v469_v46 = vpop.xlane.xlu1 %468 }
 0x3f1   :  { %v466_v44 = vpop.xlane.xlu0 %465  ;;  %3311 = vrcp.f32 %v469_v46  ;;  %v966_v46 = vld [vmem:[%s4045_s6 + $0x30] sm:$0xff] }
 0x3f2   :  { %3313 = vrcp.f32 %v466_v44 }
 0x3f7   :  { %v3655_v42 = vpop.f32.mrb[2].mxu0 }
 0x3f8   :  { %v3657_v43 = vpop.f32.mrb[3].mxu0 }
 0x3fb   :  { %v3312_v52 = vpop.eup %3311 }
 0x3fc   :  { %v3314_v58 = vpop.eup %3313 }
 0x3fe   :  { %v637_v45 = vpop.xlane.xlu0 %636 }
 0x402   :  { %v806_v20 = vpop.xlane.xlu1 %805 }
 0x403   :  { %v640_v48 = vpop.xlane.xlu0 %639 }
 0x404   :  { %3315 = vrcp.f32 %v640_v48  ;;  %v967_v48 = vld [vmem:[%s4045_s6 + $0x38] sm:$0xff] }
 0x405   :  { %3317 = vrcp.f32 %v637_v45  ;;  %v3105_v45 = vpack.c.bf16 %v965_v31, %v964_v30  ;;  %v3109_v49 = vpack.c.bf16 %v967_v48, %v966_v46 }
 0x407   :  { %3106 = vmatprep.subr.bf16.mxu1 %v3105_v45 }
 0x408   :  { %3108 = vmatpush3.bf16.msra.mxu1 %v3105_v45 }
 0x409   :  { %3110 = vmatprep.subr.bf16.mxu1 %v3109_v49 }
 0x40c   :  { %3112 = vmatpush3.bf16.msra.mxu1 %v3109_v49 }
 0x40e   :  { %v3316_v1 = vpop.eup %3315 }
 0x40f   :  { %v3318_v8 = vpop.eup %3317 }
 0x433   :  { %v809_v19 = vpop.xlane.xlu0 %808 }
 0x434   :  { %3319 = vrcp.f32 %v809_v19 }
 0x435   :  { %3321 = vrcp.f32 %v806_v20 }
 0x43e   :  { %v3320_v35 = vpop.eup %3319 }
 0x43f   :  { %v3322_v39 = vpop.eup %3321 }
 0x444   :  { %v2802_v54 = vpop.f32.mrb[4].mxu0 }
 0x445   :  { %v562_v59 = vmul.f32 %v3312_v52, %v2802_v54  ;;  %v550_v60 = vpop.f32.mrb[5].mxu0  ;;  %v3113_v52 = vpack.c.bf16 %v969_v51, %v968_v50  ;;  %v970_v54 = vld [vmem:[%s4045_s6 + $0x50] sm:$0xff] }
 0x446   :  { %v561_v0 = vmul.f32 %v3314_v58, %v550_v60  ;;  %v3117_v55 = vpack.c.bf16 %v971_v47, %v970_v54  ;;  %v972_v58 = vld [vmem:[%s4045_s6 + $0x60] sm:$0xff] }
 0x447   :  { %905 = vrot.lane.b32.xlu0 %v562_v59, %s3408_s30  ;;  %3114 = vmatprep.subr.bf16.mxu1 %v3113_v52  ;;  %v973_v59 = vld [vmem:[%s4045_s6 + $0x68] sm:$0xff] }
 0x448   :  { %v2809_v2 = vpop.f32.mrb[6].mxu0  ;;  %903 = vrot.lane.b32.xlu1 %v561_v0, %s3408_s30  ;;  %3116 = vmatpush3.bf16.msra.mxu1 %v3113_v52  ;;  %v3121_v60 = vpack.c.bf16 %v973_v59, %v972_v58  ;;  %v303_v0 = vpop.xlane.xlu1 %302 }
 0x449   :  { %v731_v3 = vmul.f32 %v3316_v1, %v2809_v2  ;;  %v719_v4 = vpop.f32.mrb[7].mxu0  ;;  %3118 = vmatprep.subr.bf16.mxu1 %v3117_v55  ;;  %v306_v1 = vpop.xlane.xlu0 %305 }
 0x44a   :  { %v730_v11 = vmul.f32 %v3318_v8, %v719_v4  ;;  %3323 = vrcp.f32 %v306_v1 }
 0x44b   :  { %3325 = vrcp.f32 %v303_v0 }
 0x44c   :  { %913 = vrot.lane.b32.xlu1 %v731_v3, %s3406_s1  ;;  %3120 = vmatpush3.bf16.msra.mxu1 %v3117_v55 }
 0x44d   :  { %3122 = vmatprep.subr.bf16.mxu1 %v3121_v60 }
 0x450   :  { %911 = vrot.lane.b32.xlu1 %v730_v11, %s3406_s1  ;;  %3124 = vmatpush3.bf16.msra.mxu1 %v3121_v60 }
 0x451   :  { %3126 = vmatprep.subr.bf16.mxu1 %v3125_v63 }
 0x454   :  { %3128 = vmatpush3.bf16.msra.mxu1 %v3125_v63  ;;  %v3324_v3 = vpop.eup %3323 }
 0x455   :  { %v3326_v4 = vpop.eup %3325  ;;  %v391_v7 = vmul.f32 %v3324_v3, %v3655_v42 }
 0x456   :  { %v390_v8 = vmul.f32 %v3326_v4, %v3657_v43 }
 0x478   :  { %v2816_v36 = vpop.f32.mrb[8].mxu0 }
 0x479   :  { %v900_v40 = vmul.f32 %v3320_v35, %v2816_v36  ;;  %v888_v41 = vpop.f32.mrb[9].mxu0 }
 0x47a   :  { %v899_v44 = vmul.f32 %v3322_v39, %v888_v41 }
 0x47b   :  { %921 = vrot.lane.b32.xlu1 %v900_v40, %s3407_s2 }
 0x47c   :  { %919 = vrot.lane.b32.xlu0 %v899_v44, %s3407_s2 }
 0x4b9   :  { %v906_v5 = vpop.permute.xlu0 %905 }
 0x4ba   :  { %v904_v2 = vpop.permute.xlu1 %903  ;;  %v927_v9 = vsel %vm925_vm11, %v391_v7, %v906_v5 }
 0x4bb   :  { %v926_v11 = vsel %vm925_vm11, %v390_v8, %v904_v2 }
 0x4be   :  { %v914_v32 = vpop.permute.xlu1 %913 }
 0x4bf   :  { %v930_v12 = vsel %vm928_vm12, %v927_v9, %v914_v32 }
 0x4c2   :  { %v912_v6 = vpop.permute.xlu1 %911 }
 0x4c3   :  { %v929_v14 = vsel %vm928_vm12, %v926_v11, %v912_v6 }
 0x4ed   :  { %v922_v13 = vpop.permute.xlu1 %921 }
 0x4ee   :  { %v933_v15 = vsel %vm931_vm13, %v930_v12, %v922_v13  ;;  %v920_v42 = vpop.permute.xlu0 %919 }
 0x4ef   :  { %v941_v16 = vadd.f32 %v2582_v10, %v933_v15  ;;  %v932_v43 = vsel %vm931_vm13, %v929_v14, %v920_v42 }
 0x4f0   :  { %v940_v17 = vadd.f32 %v2582_v10, %v932_v43 }
 0x4f1   :  { %v943_v19 = vmax.f32 %v941_v16, 0.0 }
 0x4f2   :  { %v942_v18 = vmax.f32 %v940_v17, 0.0 }
 0x4f4   :  { %2849 = vmatprep.mubr.f32.mxu0 %v942_v18 }
 0x4f5   :  { %2850 = vmatmul.mubr.f32.vlgmr.msra.gmra.mrb[10].mxu0 %v943_v19 }
 0x5c8   :  { %v2851_v20 = vpop.f32.mrb[10].mxu0 }
 0x5c9   :  { %v1043_v21 = vpop.f32.mrb[11].mxu0 }
 0x5ca   :  { %2884 = vmatprep.mubr.f32.mxu1 %v1043_v21  ;;  %v3129_v22 = vpack.c.bf16 %v2851_v20, %v1043_v21  ;;  %v3772_v23 = vpack.i.bf16 %v2851_v20, %v1043_v21 }
 0x5cb   :  { %2885 = vmatmul.mubr.f32.vlgmr.msra.gmra.mrb[2].mxu1 %v2851_v20 }
 0x5cc   :  { %3130 = vmatprep.subr.bf16.mxu0 %v3129_v22 }
 0x5cd   :  { %3132 = vmatpush3.bf16.msra.mxu0 %v3129_v22 }
 0x69e   :  { %v2886_v24 = vpop.f32.mrb[2].mxu1 }
 0x69f   :  { %1329 = vperm.xlu0 %3263, %v2886_v24   ;;  %1288 = vrot.lane.b32.xlu1 %v2886_v24, %s3402_s25  ;;  %v1118_v25 = vpop.f32.mrb[3].mxu1 }
 0x6a3   :  { %1459 = vrot.lane.b32.xlu1 %v2886_v24, %s3401_s3  ;;  %1286 = vrot.lane.b32.xlu0 %v1118_v25, %s3402_s25 }
 0x6a4   :  { %3266 = vset.pattern.permute.xlu0 %v3400_v34 }
 0x6a7   :  { %1628 = vrot.lane.b32.xlu1 %v2886_v24, %s3403_s26  ;;  %1457 = vrot.lane.b32.xlu0 %v1118_v25, %s3401_s3 }
 0x6ab   :  { %1166 = vperm.xlu1 %3262, %v2886_v24   ;;  %1626 = vrot.lane.b32.xlu0 %v1118_v25, %s3403_s26 }
 0x6af   :  { %3264 = vset.pattern.permute.xlu1 %v3404_v37  ;;  %1161 = vperm.xlu0 %3266, %v1118_v25  }
 0x6b0   :  { %1500 = vperm.xlu1 %3264, %v2886_v24  }
 0x6b3   :  { %3269 = vset.pattern.permute.xlu0 %v3405_v38 }
 0x6b4   :  { %3265 = vset.pattern.permute.xlu1 %v3405_v38  ;;  %1665 = vperm.xlu0 %3269, %v1118_v25  }
 0x6b5   :  { %1669 = vperm.xlu1 %3265, %v2886_v24  }
 0x6b9   :  { %3267 = vset.pattern.permute.xlu1 %v3399_v33 }
 0x6ba   :  { %1325 = vperm.xlu1 %3267, %v1118_v25  }
 0x6be   :  { %3268 = vset.pattern.permute.xlu1 %v3404_v37 }
 0x6bf   :  { %1496 = vperm.xlu1 %3268, %v1118_v25  }
 0x6e8   :  { %1127 = vxpose.xlu1.b32.start [1/2] (short) (narrow) %v1118_v25, 8 }
 0x6ec   :  { %1128 = vxpose.xlu1.b32.end [2/2] (short) (narrow) %v2886_v24, 8 }
 0x711   :  { %v1289_v27 = vpop.permute.xlu1 %1288 }
 0x715   :  { %v1460_v30 = vpop.permute.xlu1 %1459 }
 0x719   :  { %v1629_v38 = vpop.permute.xlu1 %1628 }
 0x71e   :  { %v1330_v26 = vpop.permute.xlu0 %1329 }
 0x722   :  { %v1287_v28 = vpop.permute.xlu0 %1286 }
 0x723   :  { %1292 = vxpose.xlu0.b32.start [1/2] (short) (narrow) %v1287_v28, 8 }
 0x726   :  { %v1458_v29 = vpop.permute.xlu0 %1457 }
 0x727   :  { %1293 = vxpose.xlu0.b32.end [2/2] (short) (narrow) %v1289_v27, 8 }
 0x72a   :  { %v1627_v31 = vpop.permute.xlu0 %1626  ;;  %v1167_v35 = vpop.permute.xlu1 %1166 }
 0x72b   :  { %1463 = vxpose.xlu0.b32.start [1/2] (short) (narrow) %v1458_v29, 8  ;;  %1632 = vxpose.xlu1.b32.start [1/2] (short) (narrow) %v1627_v31, 8 }
 0x72e   :  { %v1162_v45 = vpop.permute.xlu0 %1161 }
 0x72f   :  { %1464 = vxpose.xlu0.b32.end [2/2] (short) (narrow) %v1460_v30, 8  ;;  %1633 = vxpose.xlu1.b32.end [2/2] (short) (narrow) %v1629_v38, 8  ;;  %v1501_v37 = vpop.permute.xlu1 %1500 }
 0x733   :  { %v1666_v59 = vpop.permute.xlu0 %1665 }
 0x734   :  { %v3787_v36 = vpop.permute.xlu1 %1669 }
 0x739   :  { %v1326_v39 = vpop.permute.xlu1 %1325 }
 0x73e   :  { %v1497_v40 = vpop.permute.xlu1 %1496 }
 0x74d   :  { %3285 = vset.pattern.permute.xlu1 %v3400_v34 }
 0x758   :  { %3286 = vset.pattern.permute.xlu0 %v3399_v33 }
 0x768   :  { %v1143_v41 = vpop.trf.xlu1 }
 0x769   :  { %v1172_v44 = vrot.slane %v1143_v41, %v3574_v53 }
 0x76b   :  { %v1173_v46 = vadd.f32 %v1172_v44, %v1162_v45  ;;  %v1174_v48 = vadd.f32 %v1172_v44, %v1167_v35 }
 0x76d   :  { %vm1176_vm14 = vcmp.gt.f32.partialorder %v1174_v48, 0.0  ;;  %v1178_v49 = vmul.f32 0.2, %v1174_v48  ;;  %vm1175_vm15 = vcmp.gt.f32.partialorder %v1173_v46, 0.0  ;;  %v1177_v50 = vmul.f32 0.2, %v1173_v46 }
 0x76f   :  { %v1180_v51 = vsel %vm1176_vm14, %v1174_v48, %v1178_v49  ;;  %v1179_v52 = vsel %vm1175_vm15, %v1173_v46, %v1177_v50 }
 0x770   :  { %v1182_v54 = vsel %vm54_vm1, %v1180_v51, -1e+30  ;;  %v1181_v47 = vsel %vm53_vm2, %v1179_v52, -1e+30 }
 0x771   :  { %v1186_v55 = vsel %vm76_vm0, %v1182_v54, -inf  ;;  %v1183_v58 = vsel %vm76_vm0, %v1181_v47, -inf }
 0x772   :  { %1187 = vmax.xlane.f32.xlu1 %v1186_v55  ;;  %1184 = vmax.xlane.f32.xlu0 %v1183_v58 }
 0x7a3   :  { %v1308_v60 = vpop.trf.xlu0 }
 0x7a4   :  { %v1335_v61 = vrot.slane %v1308_v60, %v3574_v53 }
 0x7a6   :  { %v1336_v62 = vadd.f32 %v1335_v61, %v1326_v39  ;;  %v1337_v63 = vadd.f32 %v1335_v61, %v1330_v26 }
 0x7a8   :  { %vm1339_vm3 = vcmp.gt.f32.partialorder %v1337_v63, 0.0  ;;  %v1341_v0 = vmul.f32 0.2, %v1337_v63  ;;  %vm1338_vm4 = vcmp.gt.f32.partialorder %v1336_v62, 0.0  ;;  %v1340_v1 = vmul.f32 0.2, %v1336_v62 }
 0x7aa   :  { %v1343_v2 = vsel %vm1339_vm3, %v1337_v63, %v1341_v0  ;;  %v1342_v32 = vsel %vm1338_vm4, %v1336_v62, %v1340_v1 }
 0x7ab   :  { %v1648_v3 = vpop.trf.xlu1  ;;  %v1479_v4 = vpop.trf.xlu0  ;;  %v1345_v5 = vsel %vm54_vm1, %v1343_v2, -1e+30  ;;  %v1344_v6 = vsel %vm53_vm2, %v1342_v32, -1e+30 }
 0x7ac   :  { %v1675_v7 = vrot.slane %v1648_v3, %v3574_v53  ;;  %v1506_v8 = vrot.slane %v1479_v4, %v3574_v53  ;;  %v1349_v9 = vsel %vm76_vm0, %v1345_v5, -inf  ;;  %v1346_v10 = vsel %vm76_vm0, %v1344_v6, -inf }
 0x7ad   :  { %1350 = vmax.xlane.f32.xlu1 %v1349_v9  ;;  %1347 = vmax.xlane.f32.xlu0 %v1346_v10 }
 0x7ae   :  { %v1676_v11 = vadd.f32 %v1675_v7, %v1666_v59  ;;  %v1507_v12 = vadd.f32 %v1506_v8, %v1497_v40  ;;  %v1508_v13 = vadd.f32 %v1506_v8, %v1501_v37  ;;  %v1677_v25 = vadd.f32 %v1675_v7, %v3787_v36 }
 0x7b0   :  { %vm1510_vm5 = vcmp.gt.f32.partialorder %v1508_v13, 0.0  ;;  %v1512_v14 = vmul.f32 0.2, %v1508_v13  ;;  %vm1509_vm6 = vcmp.gt.f32.partialorder %v1507_v12, 0.0  ;;  %v1511_v15 = vmul.f32 0.2, %v1507_v12 }
 0x7b1   :  { %vm1678_vm7 = vcmp.gt.f32.partialorder %v1676_v11, 0.0  ;;  %v1680_v42 = vmul.f32 0.2, %v1676_v11  ;;  %v1681_v26 = vmul.f32 0.2, %v1677_v25  ;;  %vm1679_vm8 = vcmp.gt.f32.partialorder %v1677_v25, 0.0 }
 0x7b2   :  { %v1514_v16 = vsel %vm1510_vm5, %v1508_v13, %v1512_v14  ;;  %v1513_v43 = vsel %vm1509_vm6, %v1507_v12, %v1511_v15 }
 0x7b3   :  { %v1516_v17 = vsel %vm54_vm1, %v1514_v16, -1e+30  ;;  %v1515_v18 = vsel %vm53_vm2, %v1513_v43, -1e+30  ;;  %v1682_v19 = vsel %vm1678_vm7, %v1676_v11, %v1680_v42  ;;  %v1683_v27 = vsel %vm1679_vm8, %v1677_v25, %v1681_v26 }
 0x7b4   :  { %v1520_v20 = vsel %vm76_vm0, %v1516_v17, -inf  ;;  %v1517_v21 = vsel %vm76_vm0, %v1515_v18, -inf  ;;  %v1684_v22 = vsel %vm53_vm2, %v1682_v19, -1e+30  ;;  %v3822_v28 = vsel %vm54_vm1, %v1683_v27, -1e+30 }
 0x7b5   :  { %1521 = vmax.xlane.f32.xlu1 %v1520_v20  ;;  %1518 = vmax.xlane.f32.xlu0 %v1517_v21  ;;  %v1686_v24 = vsel %vm76_vm0, %v1684_v22, -inf  ;;  %v1689_v29 = vsel %vm76_vm0, %v3822_v28, -inf }
 0x7b9   :  { %1687 = vmax.xlane.f32.xlu0 %v1686_v24 }
 0x7c6   :  { %3276 = vrot.lane.b32.xlu1 %v3772_v23, %s3406_s1 }
 0x7cf   :  { %3271 = vrot.lane.b32.xlu0 %v3772_v23, %s3407_s2 }
 0x7ea   :  { %1690 = vmax.xlane.f32.xlu1 %v1689_v29  ;;  %v1835_v29 = vld [vmem:[%s4047_s8] sm:$0xff] }
 0x7fb   :  { %3281 = vrot.lane.b32.xlu1 %v3772_v23, %s3408_s30 }
 0x7ff   :  { %v1188_v30 = vpop.xlane.xlu1 %1187  ;;  %v1185_v31 = vpop.xlane.xlu0 %1184 }
 0x800   :  { %v1190_v38 = vsub.f32 %v1182_v54, %v1188_v30  ;;  %v1189_v35 = vsub.f32 %v1181_v47, %v1185_v31  ;;  %v1836_v30 = vld [vmem:[%s4047_s8 + $0x8] sm:$0xff]  ;;  %v1837_v31 = vld [vmem:[%s4047_s8 + $0x10] sm:$0xff] }
 0x802   :  { %v1193_v37 = vmul.f32 1.442695, %v1190_v38  ;;  %v1191_v36 = vmul.f32 1.442695, %v1189_v35 }
 0x804   :  { %3327 = vpow2.f32 %v1193_v37  ;;  %v3145_v37 = vpack.c.bf16 %v1836_v30, %v1835_v29 }
 0x805   :  { %3329 = vpow2.f32 %v1191_v36  ;;  %v1838_v36 = vld [vmem:[%s4047_s8 + $0x18] sm:$0xff] }
 0x806   :  { %3146 = vmatprep.subr.bf16.mxu1 %v3145_v37 }
 0x807   :  { %3148 = vmatpush3.bf16.msra.mxu1 %v3145_v37 }
 0x80e   :  { %v3828_v39 = vpop.eup %3327 }
 0x80f   :  { %v3330_v40 = vpop.eup %3329  ;;  %v1198_v21 = vsel %vm76_vm0, %v3828_v39, 0.0 }
 0x810   :  { %2891 = vmatprep.mubr.msk.f32.mxu0 %vm76_vm0, %v3330_v40  ;;  %v1195_v13 = vsel %vm76_vm0, %v3330_v40, 0.0 }
 0x811   :  { %2892 = vmatmul.mubr.msk.f32.vlgmr.msra.gmra.mrb[12].mxu0 %vm76_vm0, %v3828_v39 }
 0x83a   :  { %v1351_v41 = vpop.xlane.xlu1 %1350  ;;  %v1348_v44 = vpop.xlane.xlu0 %1347 }
 0x83b   :  { %v1353_v45 = vsub.f32 %v1345_v5, %v1351_v41  ;;  %v1352_v23 = vsub.f32 %v1344_v6, %v1348_v44  ;;  %v3149_v44 = vpack.c.bf16 %v1838_v36, %v1837_v31 }
 0x83d   :  { %v1356_v46 = vmul.f32 1.442695, %v1353_v45  ;;  %v1354_v48 = vmul.f32 1.442695, %v1352_v23  ;;  %v1839_v45 = vld [vmem:[%s4047_s8 + $0x20] sm:$0xff]  ;;  %v1840_v23 = vld [vmem:[%s4047_s8 + $0x28] sm:$0xff]  ;;  %3150 = vmatprep.subr.bf16.mxu1 %v3149_v44 }
 0x83e   :  { %3152 = vmatpush3.bf16.msra.mxu1 %v3149_v44  ;;  %v2591_v44 = vld [vmem:[%s4046_s7] ss:$0 sm:$0xff] }
 0x83f   :  { %3331 = vpow2.f32 %v1356_v46 }
 0x840   :  { %3333 = vpow2.f32 %v1354_v48 }
 0x842   :  { %v1522_v49 = vpop.xlane.xlu1 %1521  ;;  %v1519_v50 = vpop.xlane.xlu0 %1518 }
 0x843   :  { %v1524_v51 = vsub.f32 %v1516_v17, %v1522_v49  ;;  %v1523_v52 = vsub.f32 %v1515_v18, %v1519_v50  ;;  %v3153_v50 = vpack.c.bf16 %v1840_v23, %v1839_v45 }
 0x845   :  { %v1525_v54 = vmul.f32 1.442695, %v1523_v52  ;;  %v1527_v47 = vmul.f32 1.442695, %v1524_v51  ;;  %3154 = vmatprep.subr.bf16.mxu1 %v3153_v50 }
 0x846   :  { %v1688_v55 = vpop.xlane.xlu0 %1687  ;;  %v3277_v58 = vpop.permute.xlu1 %3276  ;;  %3156 = vmatpush3.bf16.msra.mxu1 %v3153_v50 }
 0x847   :  { %v1692_v59 = vsub.f32 %v1684_v22, %v1688_v55  ;;  %3335 = vpow2.f32 %v1525_v54  ;;  %v3279_v63 = vunpack.i.h.bf16 %v3277_v58  ;;  %v3278_v0 = vunpack.i.l.bf16 %v3277_v58  ;;  %v1841_v54 = vld [vmem:[%s4047_s8 + $0x30] sm:$0xff] }
 0x848   :  { %3337 = vpow2.f32 %v1527_v47  ;;  %v1842_v47 = vld [vmem:[%s4047_s8 + $0x38] sm:$0xff] }
 0x849   :  { %v3332_v60 = vpop.eup %3331  ;;  %v1694_v61 = vmul.f32 1.442695, %v1692_v59  ;;  %v3137_v6 = vpack.c.bf16 %v3279_v63, %v3278_v0  ;;  %v3157_v55 = vpack.c.bf16 %v1842_v47, %v1841_v54  ;;  %v1843_v59 = vld [vmem:[%s4047_s8 + $0x40] sm:$0xff]  ;;  %v1845_v63 = vld [vmem:[%s4047_s8 + $0x50] sm:$0xff]  ;;  %v1846_v0 = vld [vmem:[%s4047_s8 + $0x58] sm:$0xff] }
 0x84a   :  { %v3334_v62 = vpop.eup %3333  ;;  %v3272_v1 = vpop.permute.xlu0 %3271  ;;  %v1361_v2 = vsel %vm76_vm0, %v3332_v60, 0.0 }
 0x84b   :  { %3339 = vpow2.f32 %v1694_v61  ;;  %2898 = vmatprep.mubr.msk.f32.mxu0 %vm76_vm0, %v3334_v62  ;;  %v3274_v32 = vunpack.i.h.bf16 %v3272_v1  ;;  %v3273_v3 = vunpack.i.l.bf16 %v3272_v1  ;;  %1362 = vadd.xlane.f32.xlu1 %v1361_v2  ;;  %v1358_v4 = vsel %vm76_vm0, %v3334_v62, 0.0  ;;  %v1847_v2 = vld [vmem:[%s4047_s8 + $0x60] sm:$0xff] }
 0x84c   :  { %1359 = vadd.xlane.f32.xlu0 %v1358_v4  ;;  %3158 = vmatprep.subr.bf16.mxu1 %v3157_v55  ;;  %v3165_v1 = vpack.c.bf16 %v1846_v0, %v1845_v63 }
 0x84d   :  { %v3133_v5 = vpack.c.bf16 %v3274_v32, %v3273_v3  ;;  %3160 = vmatpush3.bf16.msra.mxu1 %v3157_v55  ;;  %v1848_v32 = vld [vmem:[%s4047_s8 + $0x68] sm:$0xff] }
 0x84e   :  { %v3169_v3 = vpack.c.bf16 %v1848_v32, %v1847_v2 }
 0x84f   :  { %3134 = vmatprep.subr.bf16.mxu0 %v3133_v5 }
 0x850   :  { %3136 = vmatpush3.bf16.msra.mxu0 %v3133_v5 }
 0x851   :  { %3138 = vmatprep.subr.bf16.mxu0 %v3137_v6  ;;  %v3336_v7 = vpop.eup %3335 }
 0x852   :  { %v1529_v8 = vsel %vm76_vm0, %v3336_v7, 0.0  ;;  %v3338_v9 = vpop.eup %3337 }
 0x853   :  { %2899 = vmatmul.mubr.msk.f32.vlgmr.msra.gmra.mrb[14].mxu0 %vm76_vm0, %v3332_v60  ;;  %1530 = vadd.xlane.f32.xlu0 %v1529_v8  ;;  %v1532_v12 = vsel %vm76_vm0, %v3338_v9, 0.0  ;;  %v1844_v60 = vld [vmem:[%s4047_s8 + $0x48] sm:$0xff] }
 0x854   :  { %3140 = vmatpush3.bf16.msra.mxu0 %v3137_v6  ;;  %2905 = vmatprep.mubr.msk.f32.mxu0 %vm76_vm0, %v3336_v7  ;;  %v3161_v62 = vpack.c.bf16 %v1844_v60, %v1843_v59  ;;  %v1849_v6 = vld [vmem:[%s4047_s8 + $0x70] sm:$0xff]  ;;  %v1850_v7 = vld [vmem:[%s4047_s8 + $0x78] sm:$0xff] }
 0x855   :  { %v3340_v10 = vpop.eup %3339  ;;  %v3173_v8 = vpack.c.bf16 %v1850_v7, %v1849_v6 }
 0x856   :  { %v1698_v11 = vsel %vm76_vm0, %v3340_v10, 0.0  ;;  %3162 = vmatprep.subr.bf16.mxu1 %v3161_v62 }
 0x857   :  { %1699 = vadd.xlane.f32.xlu1 %v1698_v11  ;;  %2906 = vmatmul.mubr.msk.f32.vlgmr.msra.gmra.mrb[16].mxu0 %vm76_vm0, %v3338_v9  ;;  %v1851_v9 = vld [vmem:[%s4048_s9] sm:$0xff]  ;;  %v1853_v11 = vld [vmem:[%s4048_s9 + $0x10] sm:$0xff] }
 0x858   :  { %1533 = vadd.xlane.f32.xlu0 %v1532_v12  ;;  %2912 = vmatprep.mubr.msk.f32.mxu0 %vm76_vm0, %v3340_v10  ;;  %v1852_v10 = vld [vmem:[%s4048_s9 + $0x8] sm:$0xff] }
 0x859   :  { %3164 = vmatpush3.bf16.msra.mxu1 %v3161_v62  ;;  %v3177_v12 = vpack.c.bf16 %v1852_v10, %v1851_v9 }
 0x85a   :  { %3166 = vmatprep.subr.bf16.mxu1 %v3165_v1 }
 0x85b   :  { %1196 = vadd.xlane.f32.xlu1 %v1195_v13  ;;  %v1854_v13 = vld [vmem:[%s4048_s9 + $0x18] sm:$0xff] }
 0x85d   :  { %3168 = vmatpush3.bf16.msra.mxu1 %v3165_v1 }
 0x85e   :  { %3170 = vmatprep.subr.bf16.mxu1 %v3169_v3 }
 0x861   :  { %3172 = vmatpush3.bf16.msra.mxu1 %v3169_v3 }
 0x862   :  { %3174 = vmatprep.subr.bf16.mxu1 %v3173_v8 }
 0x865   :  { %3176 = vmatpush3.bf16.msra.mxu1 %v3173_v8 }
 0x877   :  { %v1691_v14 = vpop.xlane.xlu1 %1690 }
 0x878   :  { %v1693_v15 = vsub.f32 %v3822_v28, %v1691_v14  ;;  %v3181_v14 = vpack.c.bf16 %v1854_v13, %v1853_v11 }
 0x87a   :  { %v1696_v42 = vmul.f32 1.442695, %v1693_v15  ;;  %v1855_v15 = vld [vmem:[%s4048_s9 + $0x20] sm:$0xff] }
 0x87b   :  { %v3282_v16 = vpop.permute.xlu1 %3281 }
 0x87c   :  { %3341 = vpow2.f32 %v1696_v42  ;;  %v3284_v43 = vunpack.i.h.bf16 %v3282_v16  ;;  %v3283_v17 = vunpack.i.l.bf16 %v3282_v16  ;;  %v1856_v42 = vld [vmem:[%s4048_s9 + $0x28] sm:$0xff] }
 0x87e   :  { %v3141_v18 = vpack.c.bf16 %v3284_v43, %v3283_v17 }
 0x880   :  { %3142 = vmatprep.subr.bf16.mxu0 %v3141_v18 }
 0x881   :  { %3144 = vmatpush3.bf16.msra.mxu0 %v3141_v18 }
 0x882   :  { %3178 = vmatprep.subr.bf16.mxu0 %v3177_v12 }
 0x886   :  { %v3342_v19 = vpop.eup %3341 }
 0x887   :  { %2913 = vmatmul.mubr.msk.f32.vlgmr.msra.gmra.mrb[18].mxu0 %vm76_vm0, %v3342_v19  ;;  %v1701_v20 = vsel %vm76_vm0, %v3342_v19, 0.0 }
 0x888   :  { %1702 = vadd.xlane.f32.xlu0 %v1701_v20  ;;  %3180 = vmatpush3.bf16.msra.mxu0 %v3177_v12 }
 0x889   :  { %3182 = vmatprep.subr.bf16.mxu0 %v3181_v14 }
 0x88c   :  { %1199 = vadd.xlane.f32.xlu0 %v1198_v21  ;;  %v3185_v21 = vpack.c.bf16 %v1856_v42, %v1855_v15  ;;  %3184 = vmatpush3.bf16.msra.mxu0 %v3181_v14 }
 0x88e   :  { %3186 = vmatprep.subr.bf16.mxu0 %v3185_v21 }
 0x890   :  { %3188 = vmatpush3.bf16.msra.mxu0 %v3185_v21 }
 0x8d8   :  { %v1363_v27 = vpop.xlane.xlu1 %1362 }
 0x8d9   :  { %v1360_v25 = vpop.xlane.xlu0 %1359  ;;  %3343 = vrcp.f32 %v1363_v27 }
 0x8da   :  { %3345 = vrcp.f32 %v1360_v25  ;;  %v1857_v25 = vld [vmem:[%s4048_s9 + $0x30] sm:$0xff] }
 0x8e0   :  { %v1531_v26 = vpop.xlane.xlu0 %1530 }
 0x8e3   :  { %v3344_v38 = vpop.eup %3343 }
 0x8e4   :  { %v3849_v22 = vpop.f32.mrb[12].mxu0  ;;  %v3346_v39 = vpop.eup %3345 }
 0x8e5   :  { %v3851_v24 = vpop.f32.mrb[13].mxu0  ;;  %v1534_v28 = vpop.xlane.xlu0 %1533 }
 0x8e6   :  { %3347 = vrcp.f32 %v1534_v28  ;;  %v1700_v5 = vpop.xlane.xlu1 %1699 }
 0x8e7   :  { %3349 = vrcp.f32 %v1531_v26  ;;  %v1858_v26 = vld [vmem:[%s4048_s9 + $0x38] sm:$0xff] }
 0x8e8   :  { %v3189_v27 = vpack.c.bf16 %v1858_v26, %v1857_v25 }
 0x8ea   :  { %3190 = vmatprep.subr.bf16.mxu0 %v3189_v27  ;;  %v1197_v28 = vpop.xlane.xlu1 %1196 }
 0x8eb   :  { %3192 = vmatpush3.bf16.msra.mxu0 %v3189_v27 }
 0x8f0   :  { %v3348_v48 = vpop.eup %3347 }
 0x8f1   :  { %v3350_v58 = vpop.eup %3349 }
 0x915   :  { %v1703_v4 = vpop.xlane.xlu0 %1702 }
 0x916   :  { %3351 = vrcp.f32 %v1703_v4 }
 0x917   :  { %3353 = vrcp.f32 %v1700_v5 }
 0x919   :  { %v1200_v29 = vpop.xlane.xlu0 %1199 }
 0x91a   :  { %3355 = vrcp.f32 %v1200_v29 }
 0x91b   :  { %3357 = vrcp.f32 %v1197_v28 }
 0x920   :  { %v3352_v16 = vpop.eup %3351 }
 0x921   :  { %v3354_v17 = vpop.eup %3353 }
 0x926   :  { %v2900_v35 = vpop.f32.mrb[14].mxu0 }
 0x927   :  { %v1456_v40 = vmul.f32 %v3344_v38, %v2900_v35  ;;  %v1444_v41 = vpop.f32.mrb[15].mxu0  ;;  %v3356_v38 = vpop.eup %3355 }
 0x928   :  { %v1455_v46 = vmul.f32 %v3346_v39, %v1444_v41  ;;  %v3358_v35 = vpop.eup %3357  ;;  %v1285_v39 = vmul.f32 %v3356_v38, %v3849_v22 }
 0x929   :  { %1799 = vrot.lane.b32.xlu0 %v1456_v40, %s3408_s30  ;;  %v1284_v40 = vmul.f32 %v3358_v35, %v3851_v24 }
 0x92a   :  { %v2907_v49 = vpop.f32.mrb[16].mxu0  ;;  %1797 = vrot.lane.b32.xlu1 %v1455_v46, %s3408_s30 }
 0x92b   :  { %v1625_v51 = vmul.f32 %v3348_v48, %v2907_v49  ;;  %v1613_v52 = vpop.f32.mrb[17].mxu0 }
 0x92c   :  { %v1624_v61 = vmul.f32 %v3350_v58, %v1613_v52 }
 0x92e   :  { %1807 = vrot.lane.b32.xlu1 %v1625_v51, %s3406_s1 }
 0x932   :  { %1805 = vrot.lane.b32.xlu1 %v1624_v61, %s3406_s1 }
 0x95a   :  { %v2914_v43 = vpop.f32.mrb[18].mxu0 }
 0x95b   :  { %v1794_v18 = vmul.f32 %v3352_v16, %v2914_v43  ;;  %v1782_v19 = vpop.f32.mrb[19].mxu0 }
 0x95c   :  { %v1793_v20 = vmul.f32 %v3354_v17, %v1782_v19 }
 0x95d   :  { %1815 = vrot.lane.b32.xlu1 %v1794_v18, %s3407_s2 }
 0x95e   :  { %1813 = vrot.lane.b32.xlu0 %v1793_v20, %s3407_s2 }
 0x99b   :  { %v1800_v37 = vpop.permute.xlu0 %1799 }
 0x99c   :  { %v1798_v30 = vpop.permute.xlu1 %1797  ;;  %v1820_v41 = vsel %vm925_vm11, %v1285_v39, %v1800_v37 }
 0x99d   :  { %v1819_v45 = vsel %vm925_vm11, %v1284_v40, %v1798_v30 }
 0x9a0   :  { %v1808_v31 = vpop.permute.xlu1 %1807 }
 0x9a1   :  { %v1822_v23 = vsel %vm928_vm12, %v1820_v41, %v1808_v31 }
 0x9a4   :  { %v1806_v36 = vpop.permute.xlu1 %1805 }
 0x9a5   :  { %v1821_v48 = vsel %vm928_vm12, %v1819_v45, %v1806_v36 }
 0x9cf   :  { %v1816_v46 = vpop.permute.xlu1 %1815 }
 0x9d0   :  { %v1824_v49 = vsel %vm931_vm13, %v1822_v23, %v1816_v46  ;;  %v1814_v50 = vpop.permute.xlu0 %1813 }
 0x9d1   :  { %v1832_v51 = vadd.f32 %v2591_v44, %v1824_v49  ;;  %v1823_v22 = vsel %vm931_vm13, %v1821_v48, %v1814_v50 }
 0x9d2   :  { %v1831_v24 = vadd.f32 %v2591_v44, %v1823_v22  ;;  %v2364_v22 = vld [vmem:[%s4050_s11] sm:$0xff] }
 0x9d3   :  { %v1834_v54 = vmax.f32 %v1832_v51, 0.0 }
 0x9d4   :  { %v1833_v52 = vmax.f32 %v1831_v24, 0.0  ;;  %v2365_v24 = vld [vmem:[%s4050_s11 + $0x8] sm:$0xff] }
 0x9d6   :  { %2947 = vmatprep.mubr.f32.mxu1 %v1833_v52  ;;  %v2366_v52 = vld [vmem:[%s4050_s11 + $0x10] sm:$0xff] }
 0x9d7   :  { %2948 = vmatmul.mubr.f32.vlgmr.msra.gmra.mrb[4].mxu1 %v1834_v54  ;;  %v3201_v54 = vpack.c.bf16 %v2365_v24, %v2364_v22 }
 0xaaa   :  { %v2949_v47 = vpop.f32.mrb[4].mxu1 }
 0xaab   :  { %v1926_v55 = vpop.f32.mrb[5].mxu1 }
 0xaac   :  { %v3289_v58 = vpack.i.bf16 %v2949_v47, %v1926_v55  ;;  %v3193_v59 = vpack.c.bf16 %v2949_v47, %v1926_v55  ;;  %2966 = vmatprep.mubr.msk.f32.mxu0 %vm928_vm12, %v1926_v55 }
 0xaad   :  { %2967 = vmatmul.mubr.msk.f32.vlgmr.msra.gmra.mrb[20].mxu0 %vm928_vm12, %v2949_v47  ;;  %v2367_v47 = vld [vmem:[%s4050_s11 + $0x18] sm:$0xff] }
 0xaae   :  { %3194 = vmatprep.subr.bf16.mxu0 %v3193_v59  ;;  %v3205_v55 = vpack.c.bf16 %v2367_v47, %v2366_v52 }
 0xaaf   :  { %3196 = vmatpush3.bf16.msra.mxu0 %v3193_v59  ;;  %v2369_v59 = vld [vmem:[%s4050_s11 + $0x28] sm:$0xff] }
 0xb80   :  { %v2968_v60 = vpop.f32.mrb[20].mxu0 }
 0xb81   :  { %2177 = vrot.lane.b32.xlu1 %v2968_v60, %s3402_s25  ;;  %v2007_v61 = vpop.f32.mrb[21].mxu0 }
 0xb82   :  { %2175 = vrot.lane.b32.xlu0 %v2007_v61, %s3402_s25 }
 0xb85   :  { %2055 = vperm.xlu1 %3285, %v2968_v60  }
 0xb86   :  { %2218 = vperm.xlu0 %3286, %v2968_v60  }
 0xb89   :  { %3288 = vset.pattern.permute.xlu1 %v3399_v33 }
 0xb8a   :  { %2214 = vperm.xlu1 %3288, %v2007_v61   ;;  %3287 = vset.pattern.permute.xlu0 %v3400_v34 }
 0xb8b   :  { %2050 = vperm.xlu0 %3287, %v2007_v61  }
 0xbb3   :  { %2016 = vxpose.xlu1.b32.start [1/2] (short) (narrow) %v2007_v61, 8 }
 0xbb7   :  { %2017 = vxpose.xlu1.b32.end [2/2] (short) (narrow) %v2968_v60, 8 }
 0xbf3   :  { %v2178_v63 = vpop.permute.xlu1 %2177 }
 0xbf4   :  { %v2176_v62 = vpop.permute.xlu0 %2175 }
 0xbf5   :  { %2181 = vxpose.xlu0.b32.start [1/2] (short) (narrow) %v2176_v62, 8 }
 0xbf9   :  { %2182 = vxpose.xlu0.b32.end [2/2] (short) (narrow) %v2178_v63, 8 }
 0xc04   :  { %v2056_v0 = vpop.permute.xlu1 %2055 }
 0xc05   :  { %v2219_v1 = vpop.permute.xlu0 %2218 }
 0xc09   :  { %v2215_v2 = vpop.permute.xlu1 %2214 }
 0xc0a   :  { %v2051_v4 = vpop.permute.xlu0 %2050 }
 0xc22   :  { %3294 = vset.pattern.permute.xlu0 %v3399_v33 }
 0xc33   :  { %v2032_v32 = vpop.trf.xlu1 }
 0xc34   :  { %v2061_v3 = vrot.slane %v2032_v32, %v3574_v53 }
 0xc36   :  { %v2062_v5 = vadd.f32 %v2061_v3, %v2051_v4  ;;  %v2063_v6 = vadd.f32 %v2061_v3, %v2056_v0  ;;  %v2373_v3 = vld [vmem:[%s4052_s13] sm:$0xff]  ;;  %v2374_v4 = vld [vmem:[%s4052_s13 + $0x8] sm:$0xff] }
 0xc38   :  { %v2067_v7 = vmul.f32 0.2, %v2063_v6  ;;  %vm2065_vm9 = vcmp.gt.f32.partialorder %v2063_v6, 0.0  ;;  %vm2064_vm10 = vcmp.gt.f32.partialorder %v2062_v5, 0.0  ;;  %v2066_v34 = vmul.f32 0.2, %v2062_v5 }
 0xc3a   :  { %v2069_v8 = vsel %vm2065_vm9, %v2063_v6, %v2067_v7  ;;  %v2068_v9 = vsel %vm2064_vm10, %v2062_v5, %v2066_v34  ;;  %v3217_v5 = vpack.c.bf16 %v2374_v4, %v2373_v3 }
 0xc3b   :  { %v2071_v10 = vsel %vm54_vm1, %v2069_v8, -1e+30  ;;  %v2070_v33 = vsel %vm53_vm2, %v2068_v9, -1e+30 }
 0xc3c   :  { %v2075_v11 = vsel %vm76_vm0, %v2071_v10, -inf  ;;  %v2072_v12 = vsel %vm76_vm0, %v2070_v33, -inf  ;;  %3218 = vmatprep.subr.bf16.mxu1 %v3217_v5 }
 0xc3d   :  { %2076 = vmax.xlane.f32.xlu1 %v2075_v11  ;;  %2073 = vmax.xlane.f32.xlu0 %v2072_v12 }
 0xc3e   :  { %3220 = vmatpush3.bf16.msra.mxu1 %v3217_v5 }
 0xc75   :  { %v2197_v13 = vpop.trf.xlu0 }
 0xc76   :  { %v2224_v14 = vrot.slane %v2197_v13, %v3574_v53 }
 0xc78   :  { %v2225_v15 = vadd.f32 %v2224_v14, %v2215_v2  ;;  %v2226_v42 = vadd.f32 %v2224_v14, %v2219_v1  ;;  %v2370_v1 = vld [vmem:[%s4050_s11 + $0x30] sm:$0xff]  ;;  %v2371_v2 = vld [vmem:[%s4050_s11 + $0x38] sm:$0xff]  ;;  %v2598_v14 = vld [vmem:[%s4049_s10] ss:$0 sm:$0xff] }
 0xc79   :  { %v3213_v32 = vpack.c.bf16 %v2371_v2, %v2370_v1 }
 0xc7a   :  { %v2229_v16 = vmul.f32 0.2, %v2225_v15  ;;  %vm2228_vm13 = vcmp.gt.f32.partialorder %v2226_v42, 0.0  ;;  %v2230_v43 = vmul.f32 0.2, %v2226_v42  ;;  %vm2227_vm14 = vcmp.gt.f32.partialorder %v2225_v15, 0.0 }
 0xc7c   :  { %v2232_v17 = vsel %vm2228_vm13, %v2226_v42, %v2230_v43  ;;  %v2231_v18 = vsel %vm2227_vm14, %v2225_v15, %v2229_v16 }
 0xc7d   :  { %v2234_v19 = vsel %vm54_vm1, %v2232_v17, -1e+30  ;;  %v2233_v20 = vsel %vm53_vm2, %v2231_v18, -1e+30 }
 0xc7e   :  { %v2238_v21 = vsel %vm76_vm0, %v2234_v19, -inf  ;;  %v2235_v25 = vsel %vm76_vm0, %v2233_v20, -inf }
 0xc7f   :  { %2239 = vmax.xlane.f32.xlu0 %v2238_v21  ;;  %2236 = vmax.xlane.f32.xlu1 %v2235_v25 }
 0xc90   :  { %3290 = vrot.lane.b32.xlu1 %v3289_v58, %s3407_s2  ;;  %v2368_v58 = vld [vmem:[%s4050_s11 + $0x20] sm:$0xff] }
 0xc91   :  { %v3209_v60 = vpack.c.bf16 %v2369_v59, %v2368_v58 }
 0xcca   :  { %v2077_v53 = vpop.xlane.xlu1 %2076  ;;  %v2074_v26 = vpop.xlane.xlu0 %2073 }
 0xccb   :  { %v2079_v27 = vsub.f32 %v2071_v10, %v2077_v53  ;;  %v2078_v28 = vsub.f32 %v2070_v33, %v2074_v26  ;;  %v2375_v53 = vld [vmem:[%s4052_s13 + $0x10] sm:$0xff]  ;;  %v2376_v26 = vld [vmem:[%s4052_s13 + $0x18] sm:$0xff]  ;;  %s3409_s13 = smov [#allocation2]  }
 0xccc   :  { %s2561_s20 = sshll.u32 %s3409_s13, 4  ;;  %s2562_s20 = int_to_ptr.vmem [resolvable:$true] %s2561_s20 }
 0xccd   :  { %v2082_v29 = vmul.f32 1.442695, %v2079_v27  ;;  %v2080_v30 = vmul.f32 1.442695, %v2078_v28  ;;  %v3221_v27 = vpack.c.bf16 %v2376_v26, %v2375_v53  ;;  %v2599_v28 = vld [vmem:[%s4051_s12] ss:$0 sm:$0xff]  ;;  %p3380_p1 = scmp.lt.s32.totalorder %s2562_s20, %s2562_s20 }
 0xcce   :  { %s3375_s12 = scalar_lea.vmem %s2562_s20, 256 }
 0xccf   :  { %3359 = vpow2.f32 %v2082_v29  ;;  %3222 = vmatprep.subr.bf16.mxu1 %v3221_v27  ;;  %p3376_p0 = scmp.ne.s32.totalorder %s2562_s20, %s3375_s12  ;;  %p3381_p2 = scmp.lt.s32.totalorder %s3375_s12, %s3375_s12 }
 0xcd0   :  { %3361 = vpow2.f32 %v2080_v30  ;;  %3224 = vmatpush3.bf16.msra.mxu1 %v3221_v27 }
 0xcd1   :  { %p3382_p3 = por %p3381_p2, %p3380_p1 }
 0xcd3   :  { %p3383_p4 = pnand %p3382_p3, %p3376_p0 }
 0xcd9   :  { %v3360_v56 = vpop.eup %3359 }
 0xcda   :  { %v3362_v31 = vpop.eup %3361  ;;  %v2087_v51 = vsel %vm76_vm0, %v3360_v56, 0.0 }
 0xcdb   :  { %2973 = vmatprep.mubr.msk.f32.mxu0 %vm76_vm0, %v3362_v31  ;;  %v2084_v50 = vsel %vm76_vm0, %v3362_v31, 0.0 }
 0xcdc   :  { %2974 = vmatmul.mubr.msk.f32.vlgmr.msra.gmra.mrb[22].mxu0 %vm76_vm0, %v3360_v56 }
 0xd0c   :  { %v2237_v57 = vpop.xlane.xlu1 %2236  ;;  %v2240_v38 = vpop.xlane.xlu0 %2239 }
 0xd0d   :  { %v2241_v35 = vsub.f32 %v2233_v20, %v2237_v57  ;;  %v2242_v37 = vsub.f32 %v2234_v19, %v2240_v38 }
 0xd0f   :  { %v2243_v36 = vmul.f32 1.442695, %v2241_v35  ;;  %v2245_v39 = vmul.f32 1.442695, %v2242_v37  ;;  %v2602_v35 = vld [vmem:[%s4053_s14] ss:$0 sm:$0xff] }
 0xd10   :  { %v3291_v40 = vpop.permute.xlu1 %3290 }
 0xd11   :  { %3363 = vpow2.f32 %v2243_v36  ;;  %v3293_v41 = vunpack.i.h.bf16 %v3291_v40  ;;  %v3292_v44 = vunpack.i.l.bf16 %v3291_v40 }
 0xd12   :  { %3365 = vpow2.f32 %v2245_v39 }
 0xd13   :  { %v3197_v45 = vpack.c.bf16 %v3293_v41, %v3292_v44 }
 0xd15   :  { %3198 = vmatprep.subr.bf16.mxu0 %v3197_v45 }
 0xd16   :  { %3200 = vmatpush3.bf16.msra.mxu0 %v3197_v45 }
 0xd17   :  { %3202 = vmatprep.subr.bf16.mxu0 %v3201_v54 }
 0xd1b   :  { %v3364_v23 = vpop.eup %3363 }
 0xd1c   :  { %v3366_v46 = vpop.eup %3365  ;;  %2980 = vmatprep.mubr.msk.f32.mxu0 %vm76_vm0, %v3364_v23  ;;  %v2247_v48 = vsel %vm76_vm0, %v3364_v23, 0.0 }
 0xd1d   :  { %2248 = vadd.xlane.f32.xlu0 %v2247_v48  ;;  %2981 = vmatmul.mubr.msk.f32.vlgmr.msra.gmra.mrb[24].mxu0 %vm76_vm0, %v3366_v46  ;;  %v2250_v49 = vsel %vm76_vm0, %v3366_v46, 0.0 }
 0xd1e   :  { %3204 = vmatpush3.bf16.msra.mxu0 %v3201_v54 }
 0xd1f   :  { %3206 = vmatprep.subr.bf16.mxu0 %v3205_v55 }
 0xd21   :  { %2251 = vadd.xlane.f32.xlu0 %v2250_v49 }
 0xd22   :  { %3208 = vmatpush3.bf16.msra.mxu0 %v3205_v55 }
 0xd23   :  { %3210 = vmatprep.subr.bf16.mxu0 %v3209_v60 }
 0xd25   :  { %2085 = vadd.xlane.f32.xlu0 %v2084_v50 }
 0xd26   :  { %3212 = vmatpush3.bf16.msra.mxu0 %v3209_v60 }
 0xd27   :  { %3214 = vmatprep.subr.bf16.mxu0 %v3213_v32 }
 0xd29   :  { %2088 = vadd.xlane.f32.xlu0 %v2087_v51 }
 0xd2a   :  { %3216 = vmatpush3.bf16.msra.mxu0 %v3213_v32 }
 0xdaa   :  { %v2249_v63 = vpop.xlane.xlu0 %2248 }
 0xdae   :  { %v2252_v0 = vpop.xlane.xlu0 %2251 }
 0xdaf   :  { %v2975_v61 = vpop.f32.mrb[22].mxu0  ;;  %3367 = vrcp.f32 %v2252_v0 }
 0xdb0   :  { %v2162_v62 = vpop.f32.mrb[23].mxu0  ;;  %3369 = vrcp.f32 %v2249_v63 }
 0xdb2   :  { %v2086_v33 = vpop.xlane.xlu0 %2085 }
 0xdb6   :  { %v2089_v11 = vpop.xlane.xlu0 %2088 }
 0xdb7   :  { %3371 = vrcp.f32 %v2089_v11 }
 0xdb8   :  { %3373 = vrcp.f32 %v2086_v33 }
 0xdb9   :  { %v3368_v6 = vpop.eup %3367 }
 0xdba   :  { %v3370_v34 = vpop.eup %3369 }
 0xdc1   :  { %v3372_v12 = vpop.eup %3371 }
 0xdc2   :  { %v3374_v13 = vpop.eup %3373  ;;  %v2174_v15 = vmul.f32 %v3372_v12, %v2975_v61 }
 0xdc3   :  { %v2173_v16 = vmul.f32 %v3374_v13, %v2162_v62 }
 0xdf0   :  { %v2982_v7 = vpop.f32.mrb[24].mxu0 }
 0xdf1   :  { %v2343_v8 = vmul.f32 %v3368_v6, %v2982_v7  ;;  %v2331_v9 = vpop.f32.mrb[25].mxu0 }
 0xdf2   :  { %v2342_v10 = vmul.f32 %v3370_v34, %v2331_v9 }
 0xdf3   :  { %2348 = vrot.lane.b32.xlu0 %v2343_v8, %s3408_s30 }
 0xdf4   :  { %2346 = vrot.lane.b32.xlu1 %v2342_v10, %s3408_s30 }
 0xe65   :  { %v2349_v42 = vpop.permute.xlu0 %2348 }
 0xe66   :  { %v2353_v43 = vsel %vm925_vm11, %v2174_v15, %v2349_v42  ;;  %v2347_v17 = vpop.permute.xlu1 %2346 }
 0xe67   :  { %v2361_v18 = vadd.f32 %v2598_v14, %v2353_v43  ;;  %v2352_v19 = vsel %vm925_vm11, %v2173_v16, %v2347_v17 }
 0xe68   :  { %v2360_v20 = vadd.f32 %v2598_v14, %v2352_v19 }
 0xe69   :  { %v2363_v25 = vmax.f32 %v2361_v18, 0.0 }
 0xe6a   :  { %v2362_v21 = vmax.f32 %v2360_v20, 0.0 }
 0xe6c   :  { %2999 = vmatprep.mubr.msk.f32.mxu0 %vm928_vm12, %v2362_v21 }
 0xe6d   :  { %3000 = vmatmul.mubr.msk.f32.vlgmr.msra.gmra.mrb[26].mxu0 %vm928_vm12, %v2363_v25 }
 0xf40   :  { %v3001_v29 = vpop.f32.mrb[26].mxu0 }
 0xf41   :  { %v2462_v30 = vadd.f32 %v3001_v29, %v2599_v28  ;;  %v2456_v56 = vpop.f32.mrb[27].mxu0 }
 0xf42   :  { %v2457_v31 = vadd.f32 %v2599_v28, %v2456_v56 }
 0xf43   :  { %v2466_v38 = vmax.f32 %v2462_v30, 0.0 }
 0xf44   :  { %v2465_v57 = vmax.f32 %v2457_v31, 0.0 }
 0xf46   :  { %3010 = vmatprep.mubr.msk.f32.mxu1 %vm925_vm11, %v2465_v57 }
 0xf47   :  { %3011 = vmatmul.mubr.msk.f32.vlgmr.msra.gmra.mrb[6].mxu1 %vm925_vm11, %v2466_v38 }
0x101a   :  { %v3012_v37 = vpop.f32.mrb[6].mxu1 }
0x101b   :  { %v2551_v36 = vadd.f32 %v3012_v37, %v2602_v35  ;;  %v2545_v39 = vpop.f32.mrb[7].mxu1 }
0x101c   :  { %v2546_v40 = vadd.f32 %v2602_v35, %v2545_v39 }
0x101d   :  { %2555 = vst.msk [vmem:[#allocation2 + $0x8] sm:$0xff] %vm928_vm12, %v2551_v36 }
0x101e   :  { %2554 = vst.msk [vmem:[#allocation2] sm:$0xff] %vm928_vm12, %v2546_v40 }
0x101f   :  { %3386 = shalt.err (!%p3383_p4)
}
0x1020   :  { %s3387_s22 = scalar_lea.hbm %s4054_s15, 256 }
0x1021   :  { %p3388_p5 = scmp.ne.s32.totalorder %s4054_s15, %s3387_s22  ;;  %p3391_p6 = scmp.lt.u32.totalorder %s3387_s22, %s4054_s15 }
0x1023   :  { %p3393_p7 = pnand %p3391_p6, %p3388_p5 }
0x1025   :  { %3396 = shalt.err (!%p3393_p7)
}
0x1026   :  { %s3410_s27 = smov 128   ;;  %s3411_s4 = smov 8  }
0x1027   :  { %2567 = dma.vmem_to_hbm [thread:$0]  %s2562_s20, 256, %s4054_s15, [#allocation3], %s3410_s27, %s3410_s27, %s3411_s4  }
0x1028   :  { %3397 = dma.done.wait [#allocation3], 256  }
0x1029   :  { %3398 = vsyncadd [#allocation3], 4294967040 }
0x102a   :  { %2571 = vsyncpa [#allocation3], 1 }

</bundles_post_ra>
